<compile_context>
chip_gen: v7x
topology: tpu7x:2x2x1
jax: 0.10.0
libtpu: 0.0.40
codegen_flags: <defaults>
</compile_context>

<pallas_src>
import functools

import jax
import jax.numpy as jnp
from jax.experimental import pallas as pl
from jax.experimental.pallas import tpu as pltpu


def _pair(v):
    if isinstance(v, (tuple, list)):
        assert len(v) == 2
        return (int(v[0]), int(v[1]))
    return (int(v), int(v))


def _pad_value(dtype):
    """Identity element for max, as a *static* python scalar."""
    dtype = jnp.dtype(dtype)
    if jnp.issubdtype(dtype, jnp.floating):
        return float("-inf")
    if jnp.issubdtype(dtype, jnp.integer):
        return int(jnp.iinfo(dtype).min)
    raise NotImplementedError(f"unsupported dtype for max pooling: {dtype}")


def _vmem_capacity_bytes():
    """Physical VMEM of the local TPU (v5e/v6e: 128 MiB, v7x: 64 MiB/TC)."""
    try:
        cap = getattr(pltpu.get_tpu_info(), "vmem_capacity_bytes", None)
        if cap:
            return int(cap)
    except Exception:
        pass
    return 64 * 1024 * 1024  # conservative default (v7x per-TensorCore)


def _round_up(v, m):
    return -(-v // m) * m


def _maxpool_kernel(x_ref, o_ref, *, kh, kw, sh, sw, dh, dw, toh, ow, H, ph,
                    wext_left, wext_right, h_tiled, fast_w, flat_out, pad_val):
    """One (batch, C-slab, OH-block) grid step.

    x_ref: (1, BH, W, TC) input rows (BH = toh*sh if h_tiled, else the full H).
    o_ref: (1, toh, OW, TC), or (1, toh, OW*TC) for the lane-dense small-C path.
    """

    def load_tap(r, i):
        """Input row feeding output row r / height tap i, shape (W, TC)."""
        if h_tiled:
            # Static in-block row index; always in-bounds for valid outputs.
            return x_ref[0, pl.ds(r * sh + i * dh, 1), :, :][0]
        # Full-H resident block: clamp + mask, so the -inf / int-min halo is
        # synthesized in registers instead of a padded copy in HBM.
        g = pl.program_id(2) * (toh * sh) - ph + r * sh + i * dh
        row = x_ref[0, pl.ds(jnp.clip(g, 0, H - 1), 1), :, :][0]
        valid = jnp.logical_and(g >= 0, g < H)
        return jnp.where(valid, row, jnp.full_like(row, pad_val))

    def wreduce(row):
        """(W, TC) -> (OW, TC) width-window max (handles the W halo / slack)."""
        tc = row.shape[-1]
        if wext_left or wext_right:
            parts = []
            if wext_left:
                parts.append(jnp.full((wext_left, tc), pad_val, row.dtype))
            parts.append(row)
            if wext_right:
                parts.append(jnp.full((wext_right, tc), pad_val, row.dtype))
            row = jnp.concatenate(parts, axis=0)
        if fast_w:
            # kw == sw, dw == 1: one contiguous reshape + reduce.
            return jnp.max(row[: kw * ow].reshape(ow, kw, tc), axis=1)

        def tap(j):
            chunk = row[j * dw: j * dw + sw * ow]        # contiguous slice
            return chunk.reshape(ow, sw, tc)[:, 0, :]    # stride-sw subsample

        acc = tap(0)
        for j in range(1, kw):
            acc = jnp.maximum(acc, tap(j))
        return acc

    for r in range(toh):                                 # static unroll
        # Width-first: each height tap is reduced to (OW, TC) immediately, so
        # no (W, TC) accumulator has to stay live across the tap loop.
        orow = wreduce(load_tap(r, 0))
        for i in range(1, kh):
            orow = jnp.maximum(orow, wreduce(load_tap(r, i)))
        if flat_out:
            o_ref[0, pl.ds(r, 1), :] = orow.reshape(1, ow * orow.shape[-1])
        else:
            o_ref[0, r, :, :] = orow


def _maxpool_call(x4, *, OH, OW, kh, kw, sh, sw, dh, dw, ph,
                  wext_left, wext_right, h_tiled, fast_w, pad_val,
                  flat_out, block_output_rows):
    N, H, W, C = x4.shape
    dtype = x4.dtype
    itemsize = jnp.dtype(dtype).itemsize

    vmem_cap = _vmem_capacity_bytes()
    budget = (2 * vmem_cap) // 3      # keep ~1/3 head-room for Mosaic internals
    margin = 4 << 20                  # temps + internal scratch allowance
    target_in = 8 << 20               # MB-scale input blocks amortize step cost

    # ---- channel tiling (lane-dense slabs when C allows) ---------------------
    if flat_out:
        TC = C                        # C < 128: lanes come from the OW*C output
    else:
        cands = [t for t in (512, 256, 128) if C % t == 0] or [C]
        TC = cands[-1]
        for cand in cands:            # biggest slab that still fits the budget
            lanes = _round_up(cand, 128)
            if h_tiled:
                need = 2 * (sh * _round_up(W, 8) + _round_up(OW, 8)) * lanes * itemsize
            else:
                need = 2 * (H * _round_up(W, 8) + _round_up(OW, 8)) * lanes * itemsize
            if need + margin <= budget:
                TC = cand
                break
    n_c = max(1, C // TC)

    tc_lanes = _round_up(TC, 128)
    per_in_rows = sh * _round_up(W, 8) * tc_lanes * itemsize   # per out row (h_tiled)
    in_fixed = H * _round_up(W, 8) * tc_lanes * itemsize       # full-H slab
    if flat_out:
        per_out_row = _round_up(OW * C, 128) * itemsize
    else:
        per_out_row = _round_up(OW, 8) * tc_lanes * itemsize

    # ---- output-row tiling (generation-aware via the VMEM budget) ------------
    in_buffers = 2
    if block_output_rows is not None:
        toh_raw = max(1, min(OH, int(block_output_rows)))
        toh_budget = OH
    elif h_tiled:
        toh_budget = max(1, (budget - margin) // (2 * (per_in_rows + per_out_row)))
        toh_target = max(1, target_in // per_in_rows)
        toh_raw = max(1, min(OH, toh_budget, toh_target))
    else:
        # Overlapping H windows: the full-H slab stays resident across oh steps.
        if 2 * in_fixed + 2 * per_out_row + margin > budget:
            in_buffers = 1            # single-buffer the resident slab (v7x)
        avail = budget - margin - in_buffers * in_fixed
        # TODO(synk): when even a single full-H slab overflows VMEM, switch to
        # memory_space=pl.ANY + make_async_copy of just the receptive-field
        # rows (manual double buffer) instead of relying on a larger limit.
        toh_budget = max(1, avail // (2 * per_out_row)) if avail > 0 else 1
        toh_target = max(8, (4 << 20) // per_out_row)
        toh_raw = max(1, min(OH, toh_budget, toh_target))

    TOH = toh_raw
    if flat_out and TOH < OH:
        # 3-D output blocks need their second-minor dim (TOH) to be a multiple
        # of 8 (or equal to the full OH).
        TOH = min(OH, max(8, (TOH // 8) * 8))
        if TOH > toh_raw and TOH > toh_budget:
            # Rounding up would blow the VMEM budget -> keep the 4-D layout.
            flat_out = False
            TOH = toh_raw
            per_out_row = _round_up(OW, 8) * tc_lanes * itemsize

    n_oh = -(-OH // TOH)
    BH = TOH * sh if h_tiled else H

    # ---- block specs ---------------------------------------------------------
    if h_tiled:
        in_index = lambda n, c, oh: (n, oh, 0, c)
    else:
        in_index = lambda n, c, oh: (n, 0, 0, c)   # constant over oh: fetched once
    in_spec_kwargs = {}
    if (not h_tiled) and in_buffers == 1:
        # The full-H slab is reused across all oh steps; single-buffer it so a
        # 64 MiB-VMEM part (v7x) is not blown by double-buffering a constant.
        in_spec_kwargs["pipeline_mode"] = pl.Buffered(1)
    in_spec = pl.BlockSpec((1, BH, W, TC), in_index, **in_spec_kwargs)

    if flat_out:
        out_shape = jax.ShapeDtypeStruct((N, OH, OW * C), dtype)
        out_spec = pl.BlockSpec((1, TOH, OW * C), lambda n, c, oh: (n, oh, 0))
    else:
        out_shape = jax.ShapeDtypeStruct((N, OH, OW, C), dtype)
        out_spec = pl.BlockSpec((1, TOH, OW, TC), lambda n, c, oh: (n, oh, 0, c))

    # ---- VMEM limit derived from the actual (layout-padded) buffer sizes -----
    in_bytes = BH * _round_up(W, 8) * tc_lanes * itemsize
    if flat_out:
        out_bytes = _round_up(TOH, 8) * _round_up(OW * C, 128) * itemsize
    else:
        out_bytes = TOH * _round_up(OW, 8) * tc_lanes * itemsize
    needed = in_buffers * in_bytes + 2 * out_bytes + margin
    vmem_limit = int(min(max(needed, 32 << 20), int(vmem_cap * 0.9)))

    # Keep oh on one TensorCore in the overlapping-H path, otherwise a megacore
    # split (v7x) re-fetches the full-H slab on both cores.
    oh_sem = "parallel" if h_tiled else "arbitrary"
    compiler_params = pltpu.CompilerParams(
        dimension_semantics=("parallel", "parallel", oh_sem),
        vmem_limit_bytes=vmem_limit)

    cost = pl.CostEstimate(
        flops=int(N * OH * OW * C * (kh * kw - 1)),
        transcendentals=0,
        bytes_accessed=int(itemsize * (N * H * W * C + N * OH * OW * C)))

    kernel = functools.partial(
        _maxpool_kernel, kh=kh, kw=kw, sh=sh, sw=sw, dh=dh, dw=dw,
        toh=TOH, ow=OW, H=H, ph=ph,
        wext_left=wext_left, wext_right=wext_right,
        h_tiled=h_tiled, fast_w=fast_w, flat_out=flat_out, pad_val=pad_val)

    return pl.pallas_call(
        kernel,
        out_shape=out_shape,
        grid=(N, n_c, n_oh),
        in_specs=[in_spec],
        out_specs=out_spec,
        compiler_params=compiler_params,
        cost_estimate=cost,
    )(x4)


def maxpool2d(x, kernel_size, stride=None, padding=0, dilation=1,
              return_indices=False, ceil_mode=False, block_output_rows=None):
    """Equivalent of the PyTorch MaxPool2d wrapper's forward (NHWC in/out)."""
    if return_indices:
        # TODO(synk): return_indices (argmax positions) not implemented.
        raise NotImplementedError("return_indices not supported")
    if ceil_mode:
        # TODO(synk): ceil_mode output-size rule not implemented (default False).
        raise NotImplementedError("ceil_mode not supported")

    kh, kw = _pair(kernel_size)
    sh, sw = _pair(stride if stride is not None else kernel_size)
    ph, pw = _pair(padding)
    dh, dw = _pair(dilation)

    *batch, H, W, C = x.shape
    x4 = x.reshape((-1, H, W, C))

    # PyTorch MaxPool2d output-size formula (floor mode).
    OH = (H + 2 * ph - dh * (kh - 1) - 1) // sh + 1
    OW = (W + 2 * pw - dw * (kw - 1) - 1) // sw + 1
    assert OH > 0 and OW > 0, "empty output"

    kh_span = dh * (kh - 1) + 1
    h_tiled = (ph == 0) and (kh_span <= sh)   # non-overlapping rows, no top halo
    fast_w = (dw == 1) and (sw == kw)         # reshape-reduce width fast path

    # In-kernel width halo / slack (replaces the old jnp.pad HBM round trip).
    w_need = kw * OW if fast_w else dw * (kw - 1) + sw * OW
    wext_left = pw
    wext_right = max(0, w_need - pw - W)

    pad_val = _pad_value(x.dtype)
    flat_out = C < 128                        # lane-dense (OW*C) stores for small C

    kwargs = dict(OH=OH, OW=OW, kh=kh, kw=kw, sh=sh, sw=sw, dh=dh, dw=dw, ph=ph,
                  wext_left=wext_left, wext_right=wext_right,
                  h_tiled=h_tiled, fast_w=fast_w, pad_val=pad_val,
                  block_output_rows=block_output_rows)

    try:
        out = _maxpool_call(x4, flat_out=flat_out, **kwargs)
    except Exception:
        if not flat_out:
            raise
        # TODO(synk): drop this fallback once the (OW, C) -> (OW*C) in-kernel
        # reshape used by the lane-dense small-C store path is guaranteed to
        # lower on every Mosaic version; the 4-D layout below always does.
        out = _maxpool_call(x4, flat_out=False, **kwargs)

    return out.reshape((*batch, OH, OW, C))


if __name__ == "__main__":
    key = jax.random.PRNGKey(0)
    # Module input convention is (*batch, H, W, C).
    x = jax.random.normal(key, (2, 16, 16, 4), dtype=jnp.float32)

    # 1) Defaults: MaxPool2d(kernel_size=2) -> stride=2, padding=0, dilation=1.
    y = jax.block_until_ready(maxpool2d(x, kernel_size=2))
    ref = jax.lax.reduce_window(x, -jnp.inf, jax.lax.max,
                                (1, 2, 2, 1), (1, 2, 2, 1), "VALID")
    assert y.shape == ref.shape and jnp.allclose(y, ref), "case 1 mismatch"

    # 2) Overlapping windows + padding (general W taps, in-kernel halo).
    y2 = jax.block_until_ready(maxpool2d(x, kernel_size=3, stride=2, padding=1))
    ref2 = jax.lax.reduce_window(x, -jnp.inf, jax.lax.max,
                                 (1, 3, 3, 1), (1, 2, 2, 1),
                                 [(0, 0), (1, 1), (1, 1), (0, 0)])
    assert y2.shape == ref2.shape and jnp.allclose(y2, ref2), "case 2 mismatch"

    # 3) Dilation (general taps, no padding, overlapping-H path).
    y3 = jax.block_until_ready(maxpool2d(x, kernel_size=2, stride=2, dilation=2))
    ref3 = jax.lax.reduce_window(x, -jnp.inf, jax.lax.max,
                                 (1, 2, 2, 1), (1, 2, 2, 1), "VALID",
                                 window_dilation=(1, 2, 2, 1))
    assert y3.shape == ref3.shape and jnp.allclose(y3, ref3), "case 3 mismatch"

    # 4) Channel-slab path (C divisible by 128, lane-dense via C).
    xc = jax.random.normal(jax.random.PRNGKey(1), (2, 16, 16, 128),
                           dtype=jnp.float32)
    y4 = jax.block_until_ready(maxpool2d(xc, kernel_size=2))
    ref4 = jax.lax.reduce_window(xc, -jnp.inf, jax.lax.max,
                                 (1, 2, 2, 1), (1, 2, 2, 1), "VALID")
    assert y4.shape == ref4.shape and jnp.allclose(y4, ref4), "case 4 mismatch"

    # 5) Multiple OH blocks + partial last block (exercises output masking).
    xh = jax.random.normal(jax.random.PRNGKey(2), (2, 36, 16, 4),
                           dtype=jnp.float32)
    y5 = jax.block_until_ready(maxpool2d(xh, kernel_size=2, block_output_rows=8))
    ref5 = jax.lax.reduce_window(xh, -jnp.inf, jax.lax.max,
                                 (1, 2, 2, 1), (1, 2, 2, 1), "VALID")
    assert y5.shape == ref5.shape and jnp.allclose(y5, ref5), "case 5 mismatch"

    print("KERNEL_OK")
</pallas_src>

<mosaic_0001>
module attributes {stable_mosaic.version = 11 : i64} {
  func.func @_maxpool_kernel(%arg0: i32, %arg1: i32, %arg2: i32, %arg3: memref<1x16x16x4xf32, #tpu.memory_space<vmem>>, %arg4: memref<1x8x32xf32, #tpu.memory_space<vmem>>) attributes {dimension_semantics = [#tpu.dimension_semantics<parallel>, #tpu.dimension_semantics<parallel>, #tpu.dimension_semantics<parallel>], iteration_bounds = array<i64: 2, 1, 1>, scalar_prefetch = 0 : i64, scratch_operands = 0 : i64, tpu.core_type = #tpu.core_type<tc>, window_params = [{transform_indices = @transform_0, window_bounds = array<i64: 1, 16, 16, 4>}, {transform_indices = @transform_1, window_bounds = array<i64: 1, 8, 32>}]} {
    %c0 = arith.constant 0 : index
    %c0_0 = arith.constant 0 : index
    %c0_1 = arith.constant 0 : index
    %c0_2 = arith.constant 0 : index
    %0 = vector.load %arg3[%c0, %c0_0, %c0_1, %c0_2] : memref<1x16x16x4xf32, #tpu.memory_space<vmem>>, vector<1x1x16x4xf32>
    %1 = vector.shape_cast %0 : vector<1x1x16x4xf32> to vector<1x16x4xf32>
    %2 = vector.shape_cast %1 : vector<1x16x4xf32> to vector<16x4xf32>
    %3 = vector.shape_cast %2 : vector<16x4xf32> to vector<8x2x4xf32>
    %cst = arith.constant dense<0xFF800000> : vector<8x4xf32>
    %4 = vector.multi_reduction <maximumf>, %3, %cst [1] : vector<8x2x4xf32> to vector<8x4xf32>
    %c0_3 = arith.constant 0 : index
    %c1 = arith.constant 1 : index
    %c0_4 = arith.constant 0 : index
    %c0_5 = arith.constant 0 : index
    %5 = vector.load %arg3[%c0_3, %c1, %c0_4, %c0_5] : memref<1x16x16x4xf32, #tpu.memory_space<vmem>>, vector<1x1x16x4xf32>
    %6 = vector.shape_cast %5 : vector<1x1x16x4xf32> to vector<1x16x4xf32>
    %7 = vector.shape_cast %6 : vector<1x16x4xf32> to vector<16x4xf32>
    %8 = vector.shape_cast %7 : vector<16x4xf32> to vector<8x2x4xf32>
    %cst_6 = arith.constant dense<0xFF800000> : vector<8x4xf32>
    %9 = vector.multi_reduction <maximumf>, %8, %cst_6 [1] : vector<8x2x4xf32> to vector<8x4xf32>
    %10 = arith.maximumf %4, %9 : vector<8x4xf32>
    %11 = vector.shape_cast %10 : vector<8x4xf32> to vector<1x32xf32>
    %c0_7 = arith.constant 0 : index
    %c0_8 = arith.constant 0 : index
    %c0_9 = arith.constant 0 : index
    %12 = vector.load %arg4[%c0_7, %c0_8, %c0_9] : memref<1x8x32xf32, #tpu.memory_space<vmem>>, vector<1x1x32xf32>
    %13 = vector.shape_cast %12 : vector<1x1x32xf32> to vector<1x32xf32>
    %14 = vector.shape_cast %11 : vector<1x32xf32> to vector<1x1x32xf32>
    tpu.vector_store %arg4[%c0_7, %c0_8, %c0_9], %14 {strides = array<i32>} : memref<1x8x32xf32, #tpu.memory_space<vmem>>, vector<1x1x32xf32>,
    %c0_10 = arith.constant 0 : index
    %c2 = arith.constant 2 : index
    %c0_11 = arith.constant 0 : index
    %c0_12 = arith.constant 0 : index
    %15 = vector.load %arg3[%c0_10, %c2, %c0_11, %c0_12] : memref<1x16x16x4xf32, #tpu.memory_space<vmem>>, vector<1x1x16x4xf32>
    %16 = vector.shape_cast %15 : vector<1x1x16x4xf32> to vector<1x16x4xf32>
    %17 = vector.shape_cast %16 : vector<1x16x4xf32> to vector<16x4xf32>
    %18 = vector.shape_cast %17 : vector<16x4xf32> to vector<8x2x4xf32>
    %cst_13 = arith.constant dense<0xFF800000> : vector<8x4xf32>
    %19 = vector.multi_reduction <maximumf>, %18, %cst_13 [1] : vector<8x2x4xf32> to vector<8x4xf32>
    %c0_14 = arith.constant 0 : index
    %c3 = arith.constant 3 : index
    %c0_15 = arith.constant 0 : index
    %c0_16 = arith.constant 0 : index
    %20 = vector.load %arg3[%c0_14, %c3, %c0_15, %c0_16] : memref<1x16x16x4xf32, #tpu.memory_space<vmem>>, vector<1x1x16x4xf32>
    %21 = vector.shape_cast %20 : vector<1x1x16x4xf32> to vector<1x16x4xf32>
    %22 = vector.shape_cast %21 : vector<1x16x4xf32> to vector<16x4xf32>
    %23 = vector.shape_cast %22 : vector<16x4xf32> to vector<8x2x4xf32>
    %cst_17 = arith.constant dense<0xFF800000> : vector<8x4xf32>
    %24 = vector.multi_reduction <maximumf>, %23, %cst_17 [1] : vector<8x2x4xf32> to vector<8x4xf32>
    %25 = arith.maximumf %19, %24 : vector<8x4xf32>
    %26 = vector.shape_cast %25 : vector<8x4xf32> to vector<1x32xf32>
    %c0_18 = arith.constant 0 : index
    %c1_19 = arith.constant 1 : index
    %c0_20 = arith.constant 0 : index
    %27 = vector.load %arg4[%c0_18, %c1_19, %c0_20] : memref<1x8x32xf32, #tpu.memory_space<vmem>>, vector<1x1x32xf32>
    %28 = vector.shape_cast %27 : vector<1x1x32xf32> to vector<1x32xf32>
    %29 = vector.shape_cast %26 : vector<1x32xf32> to vector<1x1x32xf32>
    tpu.vector_store %arg4[%c0_18, %c1_19, %c0_20], %29 {strides = array<i32>} : memref<1x8x32xf32, #tpu.memory_space<vmem>>, vector<1x1x32xf32>,
    %c0_21 = arith.constant 0 : index
    %c4 = arith.constant 4 : index
    %c0_22 = arith.constant 0 : index
    %c0_23 = arith.constant 0 : index
    %30 = vector.load %arg3[%c0_21, %c4, %c0_22, %c0_23] : memref<1x16x16x4xf32, #tpu.memory_space<vmem>>, vector<1x1x16x4xf32>
    %31 = vector.shape_cast %30 : vector<1x1x16x4xf32> to vector<1x16x4xf32>
    %32 = vector.shape_cast %31 : vector<1x16x4xf32> to vector<16x4xf32>
    %33 = vector.shape_cast %32 : vector<16x4xf32> to vector<8x2x4xf32>
    %cst_24 = arith.constant dense<0xFF800000> : vector<8x4xf32>
    %34 = vector.multi_reduction <maximumf>, %33, %cst_24 [1] : vector<8x2x4xf32> to vector<8x4xf32>
    %c0_25 = arith.constant 0 : index
    %c5 = arith.constant 5 : index
    %c0_26 = arith.constant 0 : index
    %c0_27 = arith.constant 0 : index
    %35 = vector.load %arg3[%c0_25, %c5, %c0_26, %c0_27] : memref<1x16x16x4xf32, #tpu.memory_space<vmem>>, vector<1x1x16x4xf32>
    %36 = vector.shape_cast %35 : vector<1x1x16x4xf32> to vector<1x16x4xf32>
    %37 = vector.shape_cast %36 : vector<1x16x4xf32> to vector<16x4xf32>
    %38 = vector.shape_cast %37 : vector<16x4xf32> to vector<8x2x4xf32>
    %cst_28 = arith.constant dense<0xFF800000> : vector<8x4xf32>
    %39 = vector.multi_reduction <maximumf>, %38, %cst_28 [1] : vector<8x2x4xf32> to vector<8x4xf32>
    %40 = arith.maximumf %34, %39 : vector<8x4xf32>
    %41 = vector.shape_cast %40 : vector<8x4xf32> to vector<1x32xf32>
    %c0_29 = arith.constant 0 : index
    %c2_30 = arith.constant 2 : index
    %c0_31 = arith.constant 0 : index
    %42 = vector.load %arg4[%c0_29, %c2_30, %c0_31] : memref<1x8x32xf32, #tpu.memory_space<vmem>>, vector<1x1x32xf32>
    %43 = vector.shape_cast %42 : vector<1x1x32xf32> to vector<1x32xf32>
    %44 = vector.shape_cast %41 : vector<1x32xf32> to vector<1x1x32xf32>
    tpu.vector_store %arg4[%c0_29, %c2_30, %c0_31], %44 {strides = array<i32>} : memref<1x8x32xf32, #tpu.memory_space<vmem>>, vector<1x1x32xf32>,
    %c0_32 = arith.constant 0 : index
    %c6 = arith.constant 6 : index
    %c0_33 = arith.constant 0 : index
    %c0_34 = arith.constant 0 : index
    %45 = vector.load %arg3[%c0_32, %c6, %c0_33, %c0_34] : memref<1x16x16x4xf32, #tpu.memory_space<vmem>>, vector<1x1x16x4xf32>
    %46 = vector.shape_cast %45 : vector<1x1x16x4xf32> to vector<1x16x4xf32>
    %47 = vector.shape_cast %46 : vector<1x16x4xf32> to vector<16x4xf32>
    %48 = vector.shape_cast %47 : vector<16x4xf32> to vector<8x2x4xf32>
    %cst_35 = arith.constant dense<0xFF800000> : vector<8x4xf32>
    %49 = vector.multi_reduction <maximumf>, %48, %cst_35 [1] : vector<8x2x4xf32> to vector<8x4xf32>
    %c0_36 = arith.constant 0 : index
    %c7 = arith.constant 7 : index
    %c0_37 = arith.constant 0 : index
    %c0_38 = arith.constant 0 : index
    %50 = vector.load %arg3[%c0_36, %c7, %c0_37, %c0_38] : memref<1x16x16x4xf32, #tpu.memory_space<vmem>>, vector<1x1x16x4xf32>
    %51 = vector.shape_cast %50 : vector<1x1x16x4xf32> to vector<1x16x4xf32>
    %52 = vector.shape_cast %51 : vector<1x16x4xf32> to vector<16x4xf32>
    %53 = vector.shape_cast %52 : vector<16x4xf32> to vector<8x2x4xf32>
    %cst_39 = arith.constant dense<0xFF800000> : vector<8x4xf32>
    %54 = vector.multi_reduction <maximumf>, %53, %cst_39 [1] : vector<8x2x4xf32> to vector<8x4xf32>
    %55 = arith.maximumf %49, %54 : vector<8x4xf32>
    %56 = vector.shape_cast %55 : vector<8x4xf32> to vector<1x32xf32>
    %c0_40 = arith.constant 0 : index
    %c3_41 = arith.constant 3 : index
    %c0_42 = arith.constant 0 : index
    %57 = vector.load %arg4[%c0_40, %c3_41, %c0_42] : memref<1x8x32xf32, #tpu.memory_space<vmem>>, vector<1x1x32xf32>
    %58 = vector.shape_cast %57 : vector<1x1x32xf32> to vector<1x32xf32>
    %59 = vector.shape_cast %56 : vector<1x32xf32> to vector<1x1x32xf32>
    tpu.vector_store %arg4[%c0_40, %c3_41, %c0_42], %59 {strides = array<i32>} : memref<1x8x32xf32, #tpu.memory_space<vmem>>, vector<1x1x32xf32>,
    %c0_43 = arith.constant 0 : index
    %c8 = arith.constant 8 : index
    %c0_44 = arith.constant 0 : index
    %c0_45 = arith.constant 0 : index
    %60 = vector.load %arg3[%c0_43, %c8, %c0_44, %c0_45] : memref<1x16x16x4xf32, #tpu.memory_space<vmem>>, vector<1x1x16x4xf32>
    %61 = vector.shape_cast %60 : vector<1x1x16x4xf32> to vector<1x16x4xf32>
    %62 = vector.shape_cast %61 : vector<1x16x4xf32> to vector<16x4xf32>
    %63 = vector.shape_cast %62 : vector<16x4xf32> to vector<8x2x4xf32>
    %cst_46 = arith.constant dense<0xFF800000> : vector<8x4xf32>
    %64 = vector.multi_reduction <maximumf>, %63, %cst_46 [1] : vector<8x2x4xf32> to vector<8x4xf32>
    %c0_47 = arith.constant 0 : index
    %c9 = arith.constant 9 : index
    %c0_48 = arith.constant 0 : index
    %c0_49 = arith.constant 0 : index
    %65 = vector.load %arg3[%c0_47, %c9, %c0_48, %c0_49] : memref<1x16x16x4xf32, #tpu.memory_space<vmem>>, vector<1x1x16x4xf32>
    %66 = vector.shape_cast %65 : vector<1x1x16x4xf32> to vector<1x16x4xf32>
    %67 = vector.shape_cast %66 : vector<1x16x4xf32> to vector<16x4xf32>
    %68 = vector.shape_cast %67 : vector<16x4xf32> to vector<8x2x4xf32>
    %cst_50 = arith.constant dense<0xFF800000> : vector<8x4xf32>
    %69 = vector.multi_reduction <maximumf>, %68, %cst_50 [1] : vector<8x2x4xf32> to vector<8x4xf32>
    %70 = arith.maximumf %64, %69 : vector<8x4xf32>
    %71 = vector.shape_cast %70 : vector<8x4xf32> to vector<1x32xf32>
    %c0_51 = arith.constant 0 : index
    %c4_52 = arith.constant 4 : index
    %c0_53 = arith.constant 0 : index
    %72 = vector.load %arg4[%c0_51, %c4_52, %c0_53] : memref<1x8x32xf32, #tpu.memory_space<vmem>>, vector<1x1x32xf32>
    %73 = vector.shape_cast %72 : vector<1x1x32xf32> to vector<1x32xf32>
    %74 = vector.shape_cast %71 : vector<1x32xf32> to vector<1x1x32xf32>
    tpu.vector_store %arg4[%c0_51, %c4_52, %c0_53], %74 {strides = array<i32>} : memref<1x8x32xf32, #tpu.memory_space<vmem>>, vector<1x1x32xf32>,
    %c0_54 = arith.constant 0 : index
    %c10 = arith.constant 10 : index
    %c0_55 = arith.constant 0 : index
    %c0_56 = arith.constant 0 : index
    %75 = vector.load %arg3[%c0_54, %c10, %c0_55, %c0_56] : memref<1x16x16x4xf32, #tpu.memory_space<vmem>>, vector<1x1x16x4xf32>
    %76 = vector.shape_cast %75 : vector<1x1x16x4xf32> to vector<1x16x4xf32>
    %77 = vector.shape_cast %76 : vector<1x16x4xf32> to vector<16x4xf32>
    %78 = vector.shape_cast %77 : vector<16x4xf32> to vector<8x2x4xf32>
    %cst_57 = arith.constant dense<0xFF800000> : vector<8x4xf32>
    %79 = vector.multi_reduction <maximumf>, %78, %cst_57 [1] : vector<8x2x4xf32> to vector<8x4xf32>
    %c0_58 = arith.constant 0 : index
    %c11 = arith.constant 11 : index
    %c0_59 = arith.constant 0 : index
    %c0_60 = arith.constant 0 : index
    %80 = vector.load %arg3[%c0_58, %c11, %c0_59, %c0_60] : memref<1x16x16x4xf32, #tpu.memory_space<vmem>>, vector<1x1x16x4xf32>
    %81 = vector.shape_cast %80 : vector<1x1x16x4xf32> to vector<1x16x4xf32>
    %82 = vector.shape_cast %81 : vector<1x16x4xf32> to vector<16x4xf32>
    %83 = vector.shape_cast %82 : vector<16x4xf32> to vector<8x2x4xf32>
    %cst_61 = arith.constant dense<0xFF800000> : vector<8x4xf32>
    %84 = vector.multi_reduction <maximumf>, %83, %cst_61 [1] : vector<8x2x4xf32> to vector<8x4xf32>
    %85 = arith.maximumf %79, %84 : vector<8x4xf32>
    %86 = vector.shape_cast %85 : vector<8x4xf32> to vector<1x32xf32>
    %c0_62 = arith.constant 0 : index
    %c5_63 = arith.constant 5 : index
    %c0_64 = arith.constant 0 : index
    %87 = vector.load %arg4[%c0_62, %c5_63, %c0_64] : memref<1x8x32xf32, #tpu.memory_space<vmem>>, vector<1x1x32xf32>
    %88 = vector.shape_cast %87 : vector<1x1x32xf32> to vector<1x32xf32>
    %89 = vector.shape_cast %86 : vector<1x32xf32> to vector<1x1x32xf32>
    tpu.vector_store %arg4[%c0_62, %c5_63, %c0_64], %89 {strides = array<i32>} : memref<1x8x32xf32, #tpu.memory_space<vmem>>, vector<1x1x32xf32>,
    %c0_65 = arith.constant 0 : index
    %c12 = arith.constant 12 : index
    %c0_66 = arith.constant 0 : index
    %c0_67 = arith.constant 0 : index
    %90 = vector.load %arg3[%c0_65, %c12, %c0_66, %c0_67] : memref<1x16x16x4xf32, #tpu.memory_space<vmem>>, vector<1x1x16x4xf32>
    %91 = vector.shape_cast %90 : vector<1x1x16x4xf32> to vector<1x16x4xf32>
    %92 = vector.shape_cast %91 : vector<1x16x4xf32> to vector<16x4xf32>
    %93 = vector.shape_cast %92 : vector<16x4xf32> to vector<8x2x4xf32>
    %cst_68 = arith.constant dense<0xFF800000> : vector<8x4xf32>
    %94 = vector.multi_reduction <maximumf>, %93, %cst_68 [1] : vector<8x2x4xf32> to vector<8x4xf32>
    %c0_69 = arith.constant 0 : index
    %c13 = arith.constant 13 : index
    %c0_70 = arith.constant 0 : index
    %c0_71 = arith.constant 0 : index
    %95 = vector.load %arg3[%c0_69, %c13, %c0_70, %c0_71] : memref<1x16x16x4xf32, #tpu.memory_space<vmem>>, vector<1x1x16x4xf32>
    %96 = vector.shape_cast %95 : vector<1x1x16x4xf32> to vector<1x16x4xf32>
    %97 = vector.shape_cast %96 : vector<1x16x4xf32> to vector<16x4xf32>
    %98 = vector.shape_cast %97 : vector<16x4xf32> to vector<8x2x4xf32>
    %cst_72 = arith.constant dense<0xFF800000> : vector<8x4xf32>
    %99 = vector.multi_reduction <maximumf>, %98, %cst_72 [1] : vector<8x2x4xf32> to vector<8x4xf32>
    %100 = arith.maximumf %94, %99 : vector<8x4xf32>
    %101 = vector.shape_cast %100 : vector<8x4xf32> to vector<1x32xf32>
    %c0_73 = arith.constant 0 : index
    %c6_74 = arith.constant 6 : index
    %c0_75 = arith.constant 0 : index
    %102 = vector.load %arg4[%c0_73, %c6_74, %c0_75] : memref<1x8x32xf32, #tpu.memory_space<vmem>>, vector<1x1x32xf32>
    %103 = vector.shape_cast %102 : vector<1x1x32xf32> to vector<1x32xf32>
    %104 = vector.shape_cast %101 : vector<1x32xf32> to vector<1x1x32xf32>
    tpu.vector_store %arg4[%c0_73, %c6_74, %c0_75], %104 {strides = array<i32>} : memref<1x8x32xf32, #tpu.memory_space<vmem>>, vector<1x1x32xf32>,
    %c0_76 = arith.constant 0 : index
    %c14 = arith.constant 14 : index
    %c0_77 = arith.constant 0 : index
    %c0_78 = arith.constant 0 : index
    %105 = vector.load %arg3[%c0_76, %c14, %c0_77, %c0_78] : memref<1x16x16x4xf32, #tpu.memory_space<vmem>>, vector<1x1x16x4xf32>
    %106 = vector.shape_cast %105 : vector<1x1x16x4xf32> to vector<1x16x4xf32>
    %107 = vector.shape_cast %106 : vector<1x16x4xf32> to vector<16x4xf32>
    %108 = vector.shape_cast %107 : vector<16x4xf32> to vector<8x2x4xf32>
    %cst_79 = arith.constant dense<0xFF800000> : vector<8x4xf32>
    %109 = vector.multi_reduction <maximumf>, %108, %cst_79 [1] : vector<8x2x4xf32> to vector<8x4xf32>
    %c0_80 = arith.constant 0 : index
    %c15 = arith.constant 15 : index
    %c0_81 = arith.constant 0 : index
    %c0_82 = arith.constant 0 : index
    %110 = vector.load %arg3[%c0_80, %c15, %c0_81, %c0_82] : memref<1x16x16x4xf32, #tpu.memory_space<vmem>>, vector<1x1x16x4xf32>
    %111 = vector.shape_cast %110 : vector<1x1x16x4xf32> to vector<1x16x4xf32>
    %112 = vector.shape_cast %111 : vector<1x16x4xf32> to vector<16x4xf32>
    %113 = vector.shape_cast %112 : vector<16x4xf32> to vector<8x2x4xf32>
    %cst_83 = arith.constant dense<0xFF800000> : vector<8x4xf32>
    %114 = vector.multi_reduction <maximumf>, %113, %cst_83 [1] : vector<8x2x4xf32> to vector<8x4xf32>
    %115 = arith.maximumf %109, %114 : vector<8x4xf32>
    %116 = vector.shape_cast %115 : vector<8x4xf32> to vector<1x32xf32>
    %c0_84 = arith.constant 0 : index
    %c7_85 = arith.constant 7 : index
    %c0_86 = arith.constant 0 : index
    %117 = vector.load %arg4[%c0_84, %c7_85, %c0_86] : memref<1x8x32xf32, #tpu.memory_space<vmem>>, vector<1x1x32xf32>
    %118 = vector.shape_cast %117 : vector<1x1x32xf32> to vector<1x32xf32>
    %119 = vector.shape_cast %116 : vector<1x32xf32> to vector<1x1x32xf32>
    tpu.vector_store %arg4[%c0_84, %c7_85, %c0_86], %119 {strides = array<i32>} : memref<1x8x32xf32, #tpu.memory_space<vmem>>, vector<1x1x32xf32>,
    return
  }
  func.func @transform_0(%arg0: i32, %arg1: i32, %arg2: i32) -> (i32, i32, i32, i32) {
    %c0_i32 = arith.constant 0 : i32
    %c0_i32_0 = arith.constant 0 : i32
    return %arg0, %arg2, %c0_i32, %arg1 : i32, i32, i32, i32
  }
  func.func @transform_1(%arg0: i32, %arg1: i32, %arg2: i32) -> (i32, i32, i32) {
    %c0_i32 = arith.constant 0 : i32
    %c0_i32_0 = arith.constant 0 : i32
    return %arg0, %arg2, %c0_i32 : i32, i32, i32
  }
}

module attributes {stable_mosaic.version = 11 : i64} {
  func.func @_maxpool_kernel(%arg0: i32, %arg1: i32, %arg2: i32, %arg3: memref<1x16x16x4xf32, #tpu.memory_space<vmem>>, %arg4: memref<1x8x8x4xf32, #tpu.memory_space<vmem>>) attributes {dimension_semantics = [#tpu.dimension_semantics<parallel>, #tpu.dimension_semantics<parallel>, #tpu.dimension_semantics<parallel>], iteration_bounds = array<i64: 2, 1, 1>, scalar_prefetch = 0 : i64, scratch_operands = 0 : i64, tpu.core_type = #tpu.core_type<tc>, window_params = [{transform_indices = @transform_0, window_bounds = array<i64: 1, 16, 16, 4>}, {transform_indices = @transform_1, window_bounds = array<i64: 1, 8, 8, 4>}]} {
    %c0 = arith.constant 0 : index
    %c0_0 = arith.constant 0 : index
    %c0_1 = arith.constant 0 : index
    %c0_2 = arith.constant 0 : index
    %0 = vector.load %arg3[%c0, %c0_0, %c0_1, %c0_2] : memref<1x16x16x4xf32, #tpu.memory_space<vmem>>, vector<1x1x16x4xf32>
    %1 = vector.shape_cast %0 : vector<1x1x16x4xf32> to vector<1x16x4xf32>
    %2 = vector.shape_cast %1 : vector<1x16x4xf32> to vector<16x4xf32>
    %3 = vector.shape_cast %2 : vector<16x4xf32> to vector<8x2x4xf32>
    %cst = arith.constant dense<0xFF800000> : vector<8x4xf32>
    %4 = vector.multi_reduction <maximumf>, %3, %cst [1] : vector<8x2x4xf32> to vector<8x4xf32>
    %c0_3 = arith.constant 0 : index
    %c1 = arith.constant 1 : index
    %c0_4 = arith.constant 0 : index
    %c0_5 = arith.constant 0 : index
    %5 = vector.load %arg3[%c0_3, %c1, %c0_4, %c0_5] : memref<1x16x16x4xf32, #tpu.memory_space<vmem>>, vector<1x1x16x4xf32>
    %6 = vector.shape_cast %5 : vector<1x1x16x4xf32> to vector<1x16x4xf32>
    %7 = vector.shape_cast %6 : vector<1x16x4xf32> to vector<16x4xf32>
    %8 = vector.shape_cast %7 : vector<16x4xf32> to vector<8x2x4xf32>
    %cst_6 = arith.constant dense<0xFF800000> : vector<8x4xf32>
    %9 = vector.multi_reduction <maximumf>, %8, %cst_6 [1] : vector<8x2x4xf32> to vector<8x4xf32>
    %10 = arith.maximumf %4, %9 : vector<8x4xf32>
    %c0_7 = arith.constant 0 : index
    %c0_8 = arith.constant 0 : index
    %c0_9 = arith.constant 0 : index
    %c0_10 = arith.constant 0 : index
    %11 = vector.load %arg4[%c0_7, %c0_8, %c0_9, %c0_10] : memref<1x8x8x4xf32, #tpu.memory_space<vmem>>, vector<1x1x8x4xf32>
    %12 = vector.shape_cast %11 : vector<1x1x8x4xf32> to vector<8x4xf32>
    %13 = vector.shape_cast %10 : vector<8x4xf32> to vector<1x1x8x4xf32>
    tpu.vector_store %arg4[%c0_7, %c0_8, %c0_9, %c0_10], %13 {strides = array<i32>} : memref<1x8x8x4xf32, #tpu.memory_space<vmem>>, vector<1x1x8x4xf32>,
    %c0_11 = arith.constant 0 : index
    %c2 = arith.constant 2 : index
    %c0_12 = arith.constant 0 : index
    %c0_13 = arith.constant 0 : index
    %14 = vector.load %arg3[%c0_11, %c2, %c0_12, %c0_13] : memref<1x16x16x4xf32, #tpu.memory_space<vmem>>, vector<1x1x16x4xf32>
    %15 = vector.shape_cast %14 : vector<1x1x16x4xf32> to vector<1x16x4xf32>
    %16 = vector.shape_cast %15 : vector<1x16x4xf32> to vector<16x4xf32>
    %17 = vector.shape_cast %16 : vector<16x4xf32> to vector<8x2x4xf32>
    %cst_14 = arith.constant dense<0xFF800000> : vector<8x4xf32>
    %18 = vector.multi_reduction <maximumf>, %17, %cst_14 [1] : vector<8x2x4xf32> to vector<8x4xf32>
    %c0_15 = arith.constant 0 : index
    %c3 = arith.constant 3 : index
    %c0_16 = arith.constant 0 : index
    %c0_17 = arith.constant 0 : index
    %19 = vector.load %arg3[%c0_15, %c3, %c0_16, %c0_17] : memref<1x16x16x4xf32, #tpu.memory_space<vmem>>, vector<1x1x16x4xf32>
    %20 = vector.shape_cast %19 : vector<1x1x16x4xf32> to vector<1x16x4xf32>
    %21 = vector.shape_cast %20 : vector<1x16x4xf32> to vector<16x4xf32>
    %22 = vector.shape_cast %21 : vector<16x4xf32> to vector<8x2x4xf32>
    %cst_18 = arith.constant dense<0xFF800000> : vector<8x4xf32>
    %23 = vector.multi_reduction <maximumf>, %22, %cst_18 [1] : vector<8x2x4xf32> to vector<8x4xf32>
    %24 = arith.maximumf %18, %23 : vector<8x4xf32>
    %c0_19 = arith.constant 0 : index
    %c1_20 = arith.constant 1 : index
    %c0_21 = arith.constant 0 : index
    %c0_22 = arith.constant 0 : index
    %25 = vector.load %arg4[%c0_19, %c1_20, %c0_21, %c0_22] : memref<1x8x8x4xf32, #tpu.memory_space<vmem>>, vector<1x1x8x4xf32>
    %26 = vector.shape_cast %25 : vector<1x1x8x4xf32> to vector<8x4xf32>
    %27 = vector.shape_cast %24 : vector<8x4xf32> to vector<1x1x8x4xf32>
    tpu.vector_store %arg4[%c0_19, %c1_20, %c0_21, %c0_22], %27 {strides = array<i32>} : memref<1x8x8x4xf32, #tpu.memory_space<vmem>>, vector<1x1x8x4xf32>,
    %c0_23 = arith.constant 0 : index
    %c4 = arith.constant 4 : index
    %c0_24 = arith.constant 0 : index
    %c0_25 = arith.constant 0 : index
    %28 = vector.load %arg3[%c0_23, %c4, %c0_24, %c0_25] : memref<1x16x16x4xf32, #tpu.memory_space<vmem>>, vector<1x1x16x4xf32>
    %29 = vector.shape_cast %28 : vector<1x1x16x4xf32> to vector<1x16x4xf32>
    %30 = vector.shape_cast %29 : vector<1x16x4xf32> to vector<16x4xf32>
    %31 = vector.shape_cast %30 : vector<16x4xf32> to vector<8x2x4xf32>
    %cst_26 = arith.constant dense<0xFF800000> : vector<8x4xf32>
    %32 = vector.multi_reduction <maximumf>, %31, %cst_26 [1] : vector<8x2x4xf32> to vector<8x4xf32>
    %c0_27 = arith.constant 0 : index
    %c5 = arith.constant 5 : index
    %c0_28 = arith.constant 0 : index
    %c0_29 = arith.constant 0 : index
    %33 = vector.load %arg3[%c0_27, %c5, %c0_28, %c0_29] : memref<1x16x16x4xf32, #tpu.memory_space<vmem>>, vector<1x1x16x4xf32>
    %34 = vector.shape_cast %33 : vector<1x1x16x4xf32> to vector<1x16x4xf32>
    %35 = vector.shape_cast %34 : vector<1x16x4xf32> to vector<16x4xf32>
    %36 = vector.shape_cast %35 : vector<16x4xf32> to vector<8x2x4xf32>
    %cst_30 = arith.constant dense<0xFF800000> : vector<8x4xf32>
    %37 = vector.multi_reduction <maximumf>, %36, %cst_30 [1] : vector<8x2x4xf32> to vector<8x4xf32>
    %38 = arith.maximumf %32, %37 : vector<8x4xf32>
    %c0_31 = arith.constant 0 : index
    %c2_32 = arith.constant 2 : index
    %c0_33 = arith.constant 0 : index
    %c0_34 = arith.constant 0 : index
    %39 = vector.load %arg4[%c0_31, %c2_32, %c0_33, %c0_34] : memref<1x8x8x4xf32, #tpu.memory_space<vmem>>, vector<1x1x8x4xf32>
    %40 = vector.shape_cast %39 : vector<1x1x8x4xf32> to vector<8x4xf32>
    %41 = vector.shape_cast %38 : vector<8x4xf32> to vector<1x1x8x4xf32>
    tpu.vector_store %arg4[%c0_31, %c2_32, %c0_33, %c0_34], %41 {strides = array<i32>} : memref<1x8x8x4xf32, #tpu.memory_space<vmem>>, vector<1x1x8x4xf32>,
    %c0_35 = arith.constant 0 : index
    %c6 = arith.constant 6 : index
    %c0_36 = arith.constant 0 : index
    %c0_37 = arith.constant 0 : index
    %42 = vector.load %arg3[%c0_35, %c6, %c0_36, %c0_37] : memref<1x16x16x4xf32, #tpu.memory_space<vmem>>, vector<1x1x16x4xf32>
    %43 = vector.shape_cast %42 : vector<1x1x16x4xf32> to vector<1x16x4xf32>
    %44 = vector.shape_cast %43 : vector<1x16x4xf32> to vector<16x4xf32>
    %45 = vector.shape_cast %44 : vector<16x4xf32> to vector<8x2x4xf32>
    %cst_38 = arith.constant dense<0xFF800000> : vector<8x4xf32>
    %46 = vector.multi_reduction <maximumf>, %45, %cst_38 [1] : vector<8x2x4xf32> to vector<8x4xf32>
    %c0_39 = arith.constant 0 : index
    %c7 = arith.constant 7 : index
    %c0_40 = arith.constant 0 : index
    %c0_41 = arith.constant 0 : index
    %47 = vector.load %arg3[%c0_39, %c7, %c0_40, %c0_41] : memref<1x16x16x4xf32, #tpu.memory_space<vmem>>, vector<1x1x16x4xf32>
    %48 = vector.shape_cast %47 : vector<1x1x16x4xf32> to vector<1x16x4xf32>
    %49 = vector.shape_cast %48 : vector<1x16x4xf32> to vector<16x4xf32>
    %50 = vector.shape_cast %49 : vector<16x4xf32> to vector<8x2x4xf32>
    %cst_42 = arith.constant dense<0xFF800000> : vector<8x4xf32>
    %51 = vector.multi_reduction <maximumf>, %50, %cst_42 [1] : vector<8x2x4xf32> to vector<8x4xf32>
    %52 = arith.maximumf %46, %51 : vector<8x4xf32>
    %c0_43 = arith.constant 0 : index
    %c3_44 = arith.constant 3 : index
    %c0_45 = arith.constant 0 : index
    %c0_46 = arith.constant 0 : index
    %53 = vector.load %arg4[%c0_43, %c3_44, %c0_45, %c0_46] : memref<1x8x8x4xf32, #tpu.memory_space<vmem>>, vector<1x1x8x4xf32>
    %54 = vector.shape_cast %53 : vector<1x1x8x4xf32> to vector<8x4xf32>
    %55 = vector.shape_cast %52 : vector<8x4xf32> to vector<1x1x8x4xf32>
    tpu.vector_store %arg4[%c0_43, %c3_44, %c0_45, %c0_46], %55 {strides = array<i32>} : memref<1x8x8x4xf32, #tpu.memory_space<vmem>>, vector<1x1x8x4xf32>,
    %c0_47 = arith.constant 0 : index
    %c8 = arith.constant 8 : index
    %c0_48 = arith.constant 0 : index
    %c0_49 = arith.constant 0 : index
    %56 = vector.load %arg3[%c0_47, %c8, %c0_48, %c0_49] : memref<1x16x16x4xf32, #tpu.memory_space<vmem>>, vector<1x1x16x4xf32>
    %57 = vector.shape_cast %56 : vector<1x1x16x4xf32> to vector<1x16x4xf32>
    %58 = vector.shape_cast %57 : vector<1x16x4xf32> to vector<16x4xf32>
    %59 = vector.shape_cast %58 : vector<16x4xf32> to vector<8x2x4xf32>
    %cst_50 = arith.constant dense<0xFF800000> : vector<8x4xf32>
    %60 = vector.multi_reduction <maximumf>, %59, %cst_50 [1] : vector<8x2x4xf32> to vector<8x4xf32>
    %c0_51 = arith.constant 0 : index
    %c9 = arith.constant 9 : index
    %c0_52 = arith.constant 0 : index
    %c0_53 = arith.constant 0 : index
    %61 = vector.load %arg3[%c0_51, %c9, %c0_52, %c0_53] : memref<1x16x16x4xf32, #tpu.memory_space<vmem>>, vector<1x1x16x4xf32>
    %62 = vector.shape_cast %61 : vector<1x1x16x4xf32> to vector<1x16x4xf32>
    %63 = vector.shape_cast %62 : vector<1x16x4xf32> to vector<16x4xf32>
    %64 = vector.shape_cast %63 : vector<16x4xf32> to vector<8x2x4xf32>
    %cst_54 = arith.constant dense<0xFF800000> : vector<8x4xf32>
    %65 = vector.multi_reduction <maximumf>, %64, %cst_54 [1] : vector<8x2x4xf32> to vector<8x4xf32>
    %66 = arith.maximumf %60, %65 : vector<8x4xf32>
    %c0_55 = arith.constant 0 : index
    %c4_56 = arith.constant 4 : index
    %c0_57 = arith.constant 0 : index
    %c0_58 = arith.constant 0 : index
    %67 = vector.load %arg4[%c0_55, %c4_56, %c0_57, %c0_58] : memref<1x8x8x4xf32, #tpu.memory_space<vmem>>, vector<1x1x8x4xf32>
    %68 = vector.shape_cast %67 : vector<1x1x8x4xf32> to vector<8x4xf32>
    %69 = vector.shape_cast %66 : vector<8x4xf32> to vector<1x1x8x4xf32>
    tpu.vector_store %arg4[%c0_55, %c4_56, %c0_57, %c0_58], %69 {strides = array<i32>} : memref<1x8x8x4xf32, #tpu.memory_space<vmem>>, vector<1x1x8x4xf32>,
    %c0_59 = arith.constant 0 : index
    %c10 = arith.constant 10 : index
    %c0_60 = arith.constant 0 : index
    %c0_61 = arith.constant 0 : index
    %70 = vector.load %arg3[%c0_59, %c10, %c0_60, %c0_61] : memref<1x16x16x4xf32, #tpu.memory_space<vmem>>, vector<1x1x16x4xf32>
    %71 = vector.shape_cast %70 : vector<1x1x16x4xf32> to vector<1x16x4xf32>
    %72 = vector.shape_cast %71 : vector<1x16x4xf32> to vector<16x4xf32>
    %73 = vector.shape_cast %72 : vector<16x4xf32> to vector<8x2x4xf32>
    %cst_62 = arith.constant dense<0xFF800000> : vector<8x4xf32>
    %74 = vector.multi_reduction <maximumf>, %73, %cst_62 [1] : vector<8x2x4xf32> to vector<8x4xf32>
    %c0_63 = arith.constant 0 : index
    %c11 = arith.constant 11 : index
    %c0_64 = arith.constant 0 : index
    %c0_65 = arith.constant 0 : index
    %75 = vector.load %arg3[%c0_63, %c11, %c0_64, %c0_65] : memref<1x16x16x4xf32, #tpu.memory_space<vmem>>, vector<1x1x16x4xf32>
    %76 = vector.shape_cast %75 : vector<1x1x16x4xf32> to vector<1x16x4xf32>
    %77 = vector.shape_cast %76 : vector<1x16x4xf32> to vector<16x4xf32>
    %78 = vector.shape_cast %77 : vector<16x4xf32> to vector<8x2x4xf32>
    %cst_66 = arith.constant dense<0xFF800000> : vector<8x4xf32>
    %79 = vector.multi_reduction <maximumf>, %78, %cst_66 [1] : vector<8x2x4xf32> to vector<8x4xf32>
    %80 = arith.maximumf %74, %79 : vector<8x4xf32>
    %c0_67 = arith.constant 0 : index
    %c5_68 = arith.constant 5 : index
    %c0_69 = arith.constant 0 : index
    %c0_70 = arith.constant 0 : index
    %81 = vector.load %arg4[%c0_67, %c5_68, %c0_69, %c0_70] : memref<1x8x8x4xf32, #tpu.memory_space<vmem>>, vector<1x1x8x4xf32>
    %82 = vector.shape_cast %81 : vector<1x1x8x4xf32> to vector<8x4xf32>
    %83 = vector.shape_cast %80 : vector<8x4xf32> to vector<1x1x8x4xf32>
    tpu.vector_store %arg4[%c0_67, %c5_68, %c0_69, %c0_70], %83 {strides = array<i32>} : memref<1x8x8x4xf32, #tpu.memory_space<vmem>>, vector<1x1x8x4xf32>,
    %c0_71 = arith.constant 0 : index
    %c12 = arith.constant 12 : index
    %c0_72 = arith.constant 0 : index
    %c0_73 = arith.constant 0 : index
    %84 = vector.load %arg3[%c0_71, %c12, %c0_72, %c0_73] : memref<1x16x16x4xf32, #tpu.memory_space<vmem>>, vector<1x1x16x4xf32>
    %85 = vector.shape_cast %84 : vector<1x1x16x4xf32> to vector<1x16x4xf32>
    %86 = vector.shape_cast %85 : vector<1x16x4xf32> to vector<16x4xf32>
    %87 = vector.shape_cast %86 : vector<16x4xf32> to vector<8x2x4xf32>
    %cst_74 = arith.constant dense<0xFF800000> : vector<8x4xf32>
    %88 = vector.multi_reduction <maximumf>, %87, %cst_74 [1] : vector<8x2x4xf32> to vector<8x4xf32>
    %c0_75 = arith.constant 0 : index
    %c13 = arith.constant 13 : index
    %c0_76 = arith.constant 0 : index
    %c0_77 = arith.constant 0 : index
    %89 = vector.load %arg3[%c0_75, %c13, %c0_76, %c0_77] : memref<1x16x16x4xf32, #tpu.memory_space<vmem>>, vector<1x1x16x4xf32>
    %90 = vector.shape_cast %89 : vector<1x1x16x4xf32> to vector<1x16x4xf32>
    %91 = vector.shape_cast %90 : vector<1x16x4xf32> to vector<16x4xf32>
    %92 = vector.shape_cast %91 : vector<16x4xf32> to vector<8x2x4xf32>
    %cst_78 = arith.constant dense<0xFF800000> : vector<8x4xf32>
    %93 = vector.multi_reduction <maximumf>, %92, %cst_78 [1] : vector<8x2x4xf32> to vector<8x4xf32>
    %94 = arith.maximumf %88, %93 : vector<8x4xf32>
    %c0_79 = arith.constant 0 : index
    %c6_80 = arith.constant 6 : index
    %c0_81 = arith.constant 0 : index
    %c0_82 = arith.constant 0 : index
    %95 = vector.load %arg4[%c0_79, %c6_80, %c0_81, %c0_82] : memref<1x8x8x4xf32, #tpu.memory_space<vmem>>, vector<1x1x8x4xf32>
    %96 = vector.shape_cast %95 : vector<1x1x8x4xf32> to vector<8x4xf32>
    %97 = vector.shape_cast %94 : vector<8x4xf32> to vector<1x1x8x4xf32>
    tpu.vector_store %arg4[%c0_79, %c6_80, %c0_81, %c0_82], %97 {strides = array<i32>} : memref<1x8x8x4xf32, #tpu.memory_space<vmem>>, vector<1x1x8x4xf32>,
    %c0_83 = arith.constant 0 : index
    %c14 = arith.constant 14 : index
    %c0_84 = arith.constant 0 : index
    %c0_85 = arith.constant 0 : index
    %98 = vector.load %arg3[%c0_83, %c14, %c0_84, %c0_85] : memref<1x16x16x4xf32, #tpu.memory_space<vmem>>, vector<1x1x16x4xf32>
    %99 = vector.shape_cast %98 : vector<1x1x16x4xf32> to vector<1x16x4xf32>
    %100 = vector.shape_cast %99 : vector<1x16x4xf32> to vector<16x4xf32>
    %101 = vector.shape_cast %100 : vector<16x4xf32> to vector<8x2x4xf32>
    %cst_86 = arith.constant dense<0xFF800000> : vector<8x4xf32>
    %102 = vector.multi_reduction <maximumf>, %101, %cst_86 [1] : vector<8x2x4xf32> to vector<8x4xf32>
    %c0_87 = arith.constant 0 : index
    %c15 = arith.constant 15 : index
    %c0_88 = arith.constant 0 : index
    %c0_89 = arith.constant 0 : index
    %103 = vector.load %arg3[%c0_87, %c15, %c0_88, %c0_89] : memref<1x16x16x4xf32, #tpu.memory_space<vmem>>, vector<1x1x16x4xf32>
    %104 = vector.shape_cast %103 : vector<1x1x16x4xf32> to vector<1x16x4xf32>
    %105 = vector.shape_cast %104 : vector<1x16x4xf32> to vector<16x4xf32>
    %106 = vector.shape_cast %105 : vector<16x4xf32> to vector<8x2x4xf32>
    %cst_90 = arith.constant dense<0xFF800000> : vector<8x4xf32>
    %107 = vector.multi_reduction <maximumf>, %106, %cst_90 [1] : vector<8x2x4xf32> to vector<8x4xf32>
    %108 = arith.maximumf %102, %107 : vector<8x4xf32>
    %c0_91 = arith.constant 0 : index
    %c7_92 = arith.constant 7 : index
    %c0_93 = arith.constant 0 : index
    %c0_94 = arith.constant 0 : index
    %109 = vector.load %arg4[%c0_91, %c7_92, %c0_93, %c0_94] : memref<1x8x8x4xf32, #tpu.memory_space<vmem>>, vector<1x1x8x4xf32>
    %110 = vector.shape_cast %109 : vector<1x1x8x4xf32> to vector<8x4xf32>
    %111 = vector.shape_cast %108 : vector<8x4xf32> to vector<1x1x8x4xf32>
    tpu.vector_store %arg4[%c0_91, %c7_92, %c0_93, %c0_94], %111 {strides = array<i32>} : memref<1x8x8x4xf32, #tpu.memory_space<vmem>>, vector<1x1x8x4xf32>,
    return
  }
  func.func @transform_0(%arg0: i32, %arg1: i32, %arg2: i32) -> (i32, i32, i32, i32) {
    %c0_i32 = arith.constant 0 : i32
    %c0_i32_0 = arith.constant 0 : i32
    return %arg0, %arg2, %c0_i32, %arg1 : i32, i32, i32, i32
  }
  func.func @transform_1(%arg0: i32, %arg1: i32, %arg2: i32) -> (i32, i32, i32, i32) {
    %c0_i32 = arith.constant 0 : i32
    %c0_i32_0 = arith.constant 0 : i32
    return %arg0, %arg2, %c0_i32, %arg1 : i32, i32, i32, i32
  }
}

</mosaic_0001>

<bundles_post_ra>
// kernel: tpu_custom_call.1
= control target key start
LH: loop header
LB: loop body
LE: loop exit
PB: predicated region body
PF: predicated region fallthrough
CT: control target
= control target key end

     0   :  { %s2296_s6 = smov 0   ;;  %s2298_s7 = smov 0   ;;  %s2859_s0 = inlined_call_operand.vmem [shape: f32[2,16,16,4], index: 0, kind: input, shape index: {}]   ;;  %s2860_s1 = inlined_call_operand.vmem [shape: f32[2,8,8,4], index: 1, kind: output, shape index: {}]  }
   0x1   :  { %s2300_s8 = smov 0  }
   0x2 LB: > { %s30_s9 = sadd.s32 1, %s2279_s7  ;;  %p2158_p0 = scmp.ge.s32.totalorder %s2283_s8, 1  ;;  %s2283_s8 = sphi %s2300_s8, %s11_s8   ;;  %s2279_s7 = sphi %s2298_s7, %s2862_s7   ;;  %s2275_s6 = sphi %s2296_s6, %s2861_s6  }
   0x3   : > { %p32_p1 = scmp.ge.s32.totalorder %s30_s9, 2  ;;  %p123_p2 = scmp.lt.s32.totalorder %s2283_s8, 3 }
   0x5   : > { %s2864_s9 = smov (%p32_p1, %s30_s9), 0  ;;  %p124_p3 = pnand %p2158_p0, %p123_p2 }
   0x6   : > { %p159_p4 = scmp.lt.s32.totalorder (!%p124_p3), %s2275_s6, 1  ;;  %v193_v0 = vlaneseq (!%p124_p3)  ;;  %v2285_v1 = vmov (!%p124_p3), 1983009808   ;;  %vm231_vm0 = vcmask (!%p124_p3), 25600   ;;  %vm407_vm1 = vcmask (!%p124_p3), 1041409  }
   0x7   : > { %127 = sbr.rel (%p124_p3) target bundleno = 317 (0x13d), region = 24  ;;  %v191_v2 = vunpack.c.l.s4 (!%p124_p3), %v2285_v1  ;;  %vm409_vm2 = vcmask (!%p124_p3), 1042434   ;;  %vm411_vm3 = vcmask (!%p124_p3), 1043459   ;;  %vm413_vm4 = vcmask (!%p124_p3), 1044484  }
   0x8   : > { %v194_v3 = vshrl.u32 (!%p124_p3), %v193_v0, 7  ;;  %vm415_vm5 = vcmask (!%p124_p3), 1045509   ;;  %vm417_vm6 = vcmask (!%p124_p3), 1046534   ;;  %vm419_vm7 = vcmask (!%p124_p3), 1047559  }
   0x9   : > { %v192_v4 = vunpack.c.0.s8 (!%p124_p3), %v191_v2  ;;  %vm422_vm8 = vcmask (!%p124_p3), 31744  }
   0xb   : > { %v2322_v5 = vsub.s32 (!%p124_p3), %v192_v4, %v194_v3 }
   0xe   : > { %s2866_s6 = smov (!%p159_p4, %s2275_s6), 1 }
   0xf   : > { %s2202_s10 = sshll.u32 %s2866_s6, 8  ;;  %s2203_s14 = sshll.u32 %s2866_s6, 6 }
  0x10   : > { %s2320_s13 = scalar_lea.vmem %s2859_s0, %s2202_s10  ;;  %s2413_s17 = scalar_lea.vmem %s2860_s1, %s2203_s14 }
  0x11   : > { %v185_v6 = vld [vmem:[%s2320_s13] sm:$0xff]  ;;  %v186_v7 = vld [vmem:[%s2320_s13 + $0x8] sm:$0xff]  ;;  %v2163_v8 = vld [vmem:[%s2320_s13 + $0x10] sm:$0xff] }
  0x12   : > { %v189_v9 = vcombine.high %v185_v6, %v185_v6  ;;  %v196_v10 = vrot.slane %v185_v6, %v2322_v5  ;;  %v206_v11 = vcombine.high %v186_v7, %v186_v7  ;;  %v213_v12 = vrot.slane %v186_v7, %v2322_v5  ;;  %v2330_v13 = vld [vmem:[%s2320_s13 + $0x18] sm:$0xff] }
  0x13   : > { %v293_v14 = vcombine.high %v2163_v8, %v2163_v8  ;;  %v2333_v15 = vrot.slane %v2163_v8, %v2322_v5  ;;  %v310_v16 = vcombine.high %v2330_v13, %v2330_v13  ;;  %v2339_v17 = vrot.slane %v2330_v13, %v2322_v5 }
  0x14   : > { %v203_v18 = vrot.slane %v189_v9, %v2322_v5  ;;  %v204_v19 = vcombine.high %v196_v10, %v196_v10  ;;  %v220_v20 = vrot.slane %v206_v11, %v2322_v5  ;;  %v221_v21 = vcombine.high %v213_v12, %v213_v12 }
  0x15   : > { %v232_v22 = vsel %vm231_vm0, %v196_v10, -inf  ;;  %v260_v23 = vsel %vm231_vm0, %v213_v12, -inf  ;;  %v2346_v24 = vrot.slane %v293_v14, %v2322_v5  ;;  %v308_v25 = vcombine.high %v2333_v15, %v2333_v15 }
  0x16   : > { %v205_v26 = vcombine.high %v203_v18, %v203_v18  ;;  %v222_v27 = vcombine.high %v220_v20, %v220_v20  ;;  %v233_v28 = vrot.slane %v232_v22, 4  ;;  %v239_v29 = vsel %vm231_vm0, %v204_v19, -inf }
  0x17   : > { %v240_v30 = vrot.slane %v239_v29, 4  ;;  %v246_v31 = vsel %vm231_vm0, %v203_v18, -inf  ;;  %v261_v32 = vrot.slane %v260_v23, 4  ;;  %v267_v33 = vsel %vm231_vm0, %v221_v21, -inf }
  0x18   : > { %v234_v34 = vmax.f32 %v232_v22, %v233_v28  ;;  %v247_v35 = vrot.slane %v246_v31, 4  ;;  %v253_v36 = vsel %vm231_vm0, %v205_v26, -inf  ;;  %v268_v37 = vrot.slane %v267_v33, 4 }
  0x19   : > { %v241_v38 = vmax.f32 %v239_v29, %v240_v30  ;;  %v254_v39 = vrot.slane %v253_v36, 4  ;;  %v262_v40 = vmax.f32 %v260_v23, %v261_v32  ;;  %v274_v41 = vsel %vm231_vm0, %v220_v20, -inf }
  0x1a   : > { %v235_v42 = vrot.slane %v234_v34, 2  ;;  %v248_v43 = vmax.f32 %v246_v31, %v247_v35  ;;  %v269_v44 = vmax.f32 %v267_v33, %v268_v37  ;;  %v275_v45 = vrot.slane %v274_v41, 4 }
  0x1b   : > { %v242_v46 = vrot.slane %v241_v38, 2  ;;  %v255_v47 = vmax.f32 %v253_v36, %v254_v39  ;;  %v263_v48 = vrot.slane %v262_v40, 2  ;;  %v281_v49 = vsel %vm231_vm0, %v222_v27, -inf }
  0x1c   : > { %v236_v50 = vmax.f32 %v234_v34, %v235_v42  ;;  %v249_v51 = vrot.slane %v248_v43, 2  ;;  %v270_v52 = vrot.slane %v269_v44, 2  ;;  %v276_v53 = vmax.f32 %v274_v41, %v275_v45 }
  0x1d   : > { %v243_v54 = vmax.f32 %v241_v38, %v242_v46  ;;  %v256_v55 = vrot.slane %v255_v47, 2  ;;  %v264_v56 = vmax.f32 %v262_v40, %v263_v48  ;;  %v282_v57 = vrot.slane %v281_v49, 4 }
  0x1e   : > { %v237_v58 = vrot.slane %v236_v50, 1  ;;  %v250_v59 = vmax.f32 %v248_v43, %v249_v51  ;;  %v271_v60 = vmax.f32 %v269_v44, %v270_v52  ;;  %v277_v61 = vrot.slane %v276_v53, 2 }
  0x1f   : > { %v244_v62 = vrot.slane %v243_v54, 1  ;;  %v257_v63 = vmax.f32 %v255_v47, %v256_v55  ;;  %v265_v0 = vrot.slane %v264_v56, 1  ;;  %v283_v1 = vmax.f32 %v281_v49, %v282_v57 }
  0x20   : > { %v2356_v2 = vmax.f32 %v236_v50, %v237_v58  ;;  %v251_v3 = vrot.slane %v250_v59, 1  ;;  %v272_v4 = vrot.slane %v271_v60, 1  ;;  %v278_v6 = vmax.f32 %v276_v53, %v277_v61 }
  0x21   : > { %v2358_v7 = vmax.f32 %v243_v54, %v244_v62  ;;  %v258_v8 = vrot.slane %v257_v63, 1  ;;  %v2360_v9 = vmax.f32 %v264_v56, %v265_v0  ;;  %v284_v10 = vrot.slane %v283_v1, 2 }
  0x22   : > { %v2362_v11 = vmax.f32 %v250_v59, %v251_v3  ;;  %v2364_v12 = vmax.f32 %v271_v60, %v272_v4  ;;  %v279_v14 = vrot.slane %v278_v6, 1  ;;  %v309_v18 = vcombine.high %v2346_v24, %v2346_v24 }
  0x23   : > { %v2368_v19 = vmax.f32 %v257_v63, %v258_v8  ;;  %v285_v20 = vmax.f32 %v283_v1, %v284_v10  ;;  %v324_v21 = vrot.slane %v310_v16, %v2322_v5  ;;  %v325_v22 = vcombine.high %v2339_v17, %v2339_v17 }
  0x24   : > { %v2376_v23 = vmax.f32 %v278_v6, %v279_v14  ;;  %v335_v26 = vsel %vm231_vm0, %v2333_v15, -inf  ;;  %v342_v27 = vsel %vm231_vm0, %v308_v25, -inf  ;;  %v349_v28 = vsel %vm231_vm0, %v2346_v24, -inf  ;;  %v2165_v14 = vld [vmem:[%s2320_s13 + $0x20] sm:$0xff] }
  0x25   : > { %v286_v29 = vrot.slane %v285_v20, 1  ;;  %v326_v30 = vcombine.high %v324_v21, %v324_v21  ;;  %v336_v31 = vrot.slane %v335_v26, 4  ;;  %v343_v32 = vrot.slane %v342_v27, 4 }
  0x26   : > { %v350_v33 = vrot.slane %v349_v28, 4  ;;  %v356_v13 = vsel %vm231_vm0, %v309_v18, -inf  ;;  %v363_v16 = vsel %vm231_vm0, %v2339_v17, -inf  ;;  %v370_v34 = vsel %vm231_vm0, %v325_v22, -inf }
  0x27   : > { %v2387_v35 = vmax.f32 %v285_v20, %v286_v29  ;;  %v337_v15 = vmax.f32 %v335_v26, %v336_v31  ;;  %v344_v36 = vmax.f32 %v342_v27, %v343_v32  ;;  %v357_v25 = vrot.slane %v356_v13, 4 }
  0x28   : > { %v351_v37 = vmax.f32 %v349_v28, %v350_v33  ;;  %v364_v38 = vrot.slane %v363_v16, 4  ;;  %v371_v24 = vrot.slane %v370_v34, 4  ;;  %v377_v39 = vsel %vm231_vm0, %v324_v21, -inf  ;;  %v2166_v33 = vld [vmem:[%s2320_s13 + $0x28] sm:$0xff] }
  0x29   : > { %v338_v40 = vrot.slane %v337_v15, 2  ;;  %v345_v41 = vrot.slane %v344_v36, 2  ;;  %v358_v42 = vmax.f32 %v356_v13, %v357_v25  ;;  %v378_v43 = vrot.slane %v377_v39, 4 }
  0x2a   : > { %v352_v44 = vrot.slane %v351_v37, 2  ;;  %v365_v17 = vmax.f32 %v363_v16, %v364_v38  ;;  %v372_v45 = vmax.f32 %v370_v34, %v371_v24  ;;  %v384_v46 = vsel %vm231_vm0, %v326_v30, -inf }
  0x2b   : > { %v339_v47 = vmax.f32 %v337_v15, %v338_v40  ;;  %v346_v48 = vmax.f32 %v344_v36, %v345_v41  ;;  %v359_v49 = vrot.slane %v358_v42, 2  ;;  %v379_v50 = vmax.f32 %v377_v39, %v378_v43 }
  0x2c   : > { %v353_v51 = vmax.f32 %v351_v37, %v352_v44  ;;  %v366_v52 = vrot.slane %v365_v17, 2  ;;  %v373_v53 = vrot.slane %v372_v45, 2  ;;  %v385_v54 = vrot.slane %v384_v46, 4 }
  0x2d   : > { %v340_v55 = vrot.slane %v339_v47, 1  ;;  %v347_v56 = vrot.slane %v346_v48, 1  ;;  %v360_v57 = vmax.f32 %v358_v42, %v359_v49  ;;  %v380_v58 = vrot.slane %v379_v50, 2 }
  0x2e   : > { %v354_v59 = vrot.slane %v353_v51, 1  ;;  %v367_v60 = vmax.f32 %v365_v17, %v366_v52  ;;  %v374_v61 = vmax.f32 %v372_v45, %v373_v53  ;;  %v386_v62 = vmax.f32 %v384_v46, %v385_v54 }
  0x2f   : > { %v341_v63 = vmax.f32 %v339_v47, %v340_v55  ;;  %v348_v0 = vmax.f32 %v346_v48, %v347_v56  ;;  %v361_v1 = vrot.slane %v360_v57, 1  ;;  %v381_v3 = vmax.f32 %v379_v50, %v380_v58 }
  0x30   : > { %v355_v4 = vmax.f32 %v353_v51, %v354_v59  ;;  %v368_v6 = vrot.slane %v367_v60, 1  ;;  %v375_v8 = vrot.slane %v374_v61, 1  ;;  %v387_v10 = vrot.slane %v386_v62, 2 }
  0x31   : > { %v362_v18 = vmax.f32 %v360_v57, %v361_v1  ;;  %v382_v20 = vrot.slane %v381_v3, 1  ;;  %v391_v21 = vmax.f32 %v2356_v2, %v341_v63  ;;  %v392_v22 = vmax.f32 %v2358_v7, %v348_v0 }
  0x32   : > { %v369_v26 = vmax.f32 %v367_v60, %v368_v6  ;;  %v376_v27 = vmax.f32 %v374_v61, %v375_v8  ;;  %v388_v28 = vmax.f32 %v386_v62, %v387_v10  ;;  %v393_v29 = vmax.f32 %v2362_v11, %v355_v4 }
  0x33   : > { %v383_v30 = vmax.f32 %v381_v3, %v382_v20  ;;  %v394_v31 = vmax.f32 %v2368_v19, %v362_v18  ;;  %v408_v32 = vsel %vm407_vm1, %v392_v22, %v391_v21  ;;  %v429_v13 = vcombine.high %v2165_v14, %v2165_v14 }
  0x34   : > { %v389_v16 = vrot.slane %v388_v28, 1  ;;  %v395_v34 = vmax.f32 %v2360_v9, %v369_v26  ;;  %v396_v15 = vmax.f32 %v2364_v12, %v376_v27  ;;  %v410_v2 = vsel %vm409_vm2, %v393_v29, %v408_v32  ;;  %v2167_v32 = vld [vmem:[%s2320_s13 + $0x30] sm:$0xff] }
  0x35   : > { %v397_v7 = vmax.f32 %v2376_v23, %v383_v30  ;;  %v412_v36 = vsel %vm411_vm3, %v394_v31, %v410_v2  ;;  %v436_v11 = vrot.slane %v2165_v14, %v2322_v5  ;;  %v443_v19 = vrot.slane %v429_v13, %v2322_v5 }
  0x36   : > { %v390_v25 = vmax.f32 %v388_v28, %v389_v16  ;;  %v414_v37 = vsel %vm413_vm4, %v395_v34, %v412_v36  ;;  %v446_v38 = vcombine.high %v2166_v33, %v2166_v33  ;;  %v453_v24 = vrot.slane %v2166_v33, %v2322_v5 }
  0x37   : > { %v416_v9 = vsel %vm415_vm5, %v396_v15, %v414_v37  ;;  %v444_v12 = vcombine.high %v436_v11, %v436_v11  ;;  %v445_v39 = vcombine.high %v443_v19, %v443_v19  ;;  %v471_v40 = vsel %vm231_vm0, %v436_v11, -inf  ;;  %v2168_v15 = vld [vmem:[%s2320_s13 + $0x38] sm:$0xff] }
  0x38   : > { %v398_v23 = vmax.f32 %v2387_v35, %v390_v25  ;;  %v418_v41 = vsel %vm417_vm6, %v397_v7, %v416_v9  ;;  %v460_v42 = vrot.slane %v446_v38, %v2322_v5  ;;  %v461_v43 = vcombine.high %v453_v24, %v453_v24 }
  0x39   : > { %v472_v44 = vrot.slane %v471_v40, 4  ;;  %v478_v17 = vsel %vm231_vm0, %v444_v12, -inf  ;;  %v485_v45 = vsel %vm231_vm0, %v443_v19, -inf  ;;  %v492_v46 = vsel %vm231_vm0, %v445_v39, -inf }
  0x3a   : > { %v420_v47 = vsel %vm419_vm7, %v398_v23, %v418_v41  ;;  %v462_v48 = vcombine.high %v460_v42, %v460_v42  ;;  %v479_v49 = vrot.slane %v478_v17, 4  ;;  %v486_v50 = vrot.slane %v485_v45, 4 }
  0x3b   : > { %423 = vst.msk [vmem:[%s2413_s17] sm:$0xff] %vm422_vm8, %v420_v47  ;;  %v473_v35 = vmax.f32 %v471_v40, %v472_v44  ;;  %v493_v51 = vrot.slane %v492_v46, 4  ;;  %v499_v52 = vsel %vm231_vm0, %v453_v24, -inf  ;;  %v506_v53 = vsel %vm231_vm0, %v461_v43, -inf  ;;  %v2439_v24 = vld [vmem:[%s2320_s13 + $0x40] sm:$0xff] }
  0x3c   : > { %v480_v54 = vmax.f32 %v478_v17, %v479_v49  ;;  %v487_v55 = vmax.f32 %v485_v45, %v486_v50  ;;  %v500_v56 = vrot.slane %v499_v52, 4  ;;  %v507_v57 = vrot.slane %v506_v53, 4 }
  0x3d   : > { %v474_v58 = vrot.slane %v473_v35, 2  ;;  %v494_v59 = vmax.f32 %v492_v46, %v493_v51  ;;  %v513_v60 = vsel %vm231_vm0, %v460_v42, -inf  ;;  %v520_v61 = vsel %vm231_vm0, %v462_v48, -inf }
  0x3e   : > { %v481_v62 = vrot.slane %v480_v54, 2  ;;  %v488_v63 = vrot.slane %v487_v55, 2  ;;  %v501_v0 = vmax.f32 %v499_v52, %v500_v56  ;;  %v508_v1 = vmax.f32 %v506_v53, %v507_v57 }
  0x3f   : > { %v475_v3 = vmax.f32 %v473_v35, %v474_v58  ;;  %v495_v4 = vrot.slane %v494_v59, 2  ;;  %v514_v6 = vrot.slane %v513_v60, 4  ;;  %v521_v8 = vrot.slane %v520_v61, 4 }
  0x40   : > { %v482_v10 = vmax.f32 %v480_v54, %v481_v62  ;;  %v489_v14 = vmax.f32 %v487_v55, %v488_v63  ;;  %v502_v18 = vrot.slane %v501_v0, 2  ;;  %v509_v20 = vrot.slane %v508_v1, 2 }
  0x41   : > { %v476_v21 = vrot.slane %v475_v3, 1  ;;  %v496_v22 = vmax.f32 %v494_v59, %v495_v4  ;;  %v515_v26 = vmax.f32 %v513_v60, %v514_v6  ;;  %v522_v27 = vmax.f32 %v520_v61, %v521_v8 }
  0x42   : > { %v483_v28 = vrot.slane %v482_v10, 1  ;;  %v490_v29 = vrot.slane %v489_v14, 1  ;;  %v503_v30 = vmax.f32 %v501_v0, %v502_v18  ;;  %v510_v31 = vmax.f32 %v508_v1, %v509_v20 }
  0x43   : > { %v2429_v33 = vmax.f32 %v475_v3, %v476_v21  ;;  %v497_v13 = vrot.slane %v496_v22, 1  ;;  %v516_v16 = vrot.slane %v515_v26, 2  ;;  %v523_v34 = vrot.slane %v522_v27, 2 }
  0x44   : > { %v2432_v2 = vmax.f32 %v482_v10, %v483_v28  ;;  %v2434_v7 = vmax.f32 %v489_v14, %v490_v29  ;;  %v504_v36 = vrot.slane %v503_v30, 1  ;;  %v511_v11 = vrot.slane %v510_v31, 1 }
  0x45   : > { %v2436_v19 = vmax.f32 %v496_v22, %v497_v13  ;;  %v517_v25 = vmax.f32 %v515_v26, %v516_v16  ;;  %v524_v37 = vmax.f32 %v522_v27, %v523_v34  ;;  %v532_v38 = vcombine.high %v2167_v32, %v2167_v32 }
  0x46   : > { %v2441_v9 = vmax.f32 %v503_v30, %v504_v36  ;;  %v2443_v12 = vmax.f32 %v510_v31, %v511_v11  ;;  %v539_v39 = vrot.slane %v2167_v32, %v2322_v5  ;;  %v549_v40 = vcombine.high %v2168_v15, %v2168_v15 }
  0x47   : > { %v518_v23 = vrot.slane %v517_v25, 1  ;;  %v525_v41 = vrot.slane %v524_v37, 1  ;;  %v546_v42 = vrot.slane %v532_v38, %v2322_v5  ;;  %v556_v43 = vrot.slane %v2168_v15, %v2322_v5 }
  0x48   : > { %v547_v44 = vcombine.high %v539_v39, %v539_v39  ;;  %v563_v17 = vrot.slane %v549_v40, %v2322_v5  ;;  %v574_v45 = vsel %vm231_vm0, %v539_v39, -inf  ;;  %v661_v46 = vcombine.high %v2439_v24, %v2439_v24 }
  0x49   : > { %v2452_v47 = vmax.f32 %v517_v25, %v518_v23  ;;  %v2454_v48 = vmax.f32 %v524_v37, %v525_v41  ;;  %v548_v49 = vcombine.high %v546_v42, %v546_v42  ;;  %v564_v50 = vcombine.high %v556_v43, %v556_v43 }
  0x4a   : > { %v565_v35 = vcombine.high %v563_v17, %v563_v17  ;;  %v575_v51 = vrot.slane %v574_v45, 4  ;;  %v581_v52 = vsel %vm231_vm0, %v547_v44, -inf  ;;  %v588_v53 = vsel %vm231_vm0, %v546_v42, -inf }
  0x4b   : > { %v582_v54 = vrot.slane %v581_v52, 4  ;;  %v589_v55 = vrot.slane %v588_v53, 4  ;;  %v595_v56 = vsel %vm231_vm0, %v548_v49, -inf  ;;  %v602_v57 = vsel %vm231_vm0, %v556_v43, -inf }
  0x4c   : > { %v576_v58 = vmax.f32 %v574_v45, %v575_v51  ;;  %v596_v59 = vrot.slane %v595_v56, 4  ;;  %v603_v60 = vrot.slane %v602_v57, 4  ;;  %v609_v61 = vsel %vm231_vm0, %v564_v50, -inf }
  0x4d   : > { %v583_v62 = vmax.f32 %v581_v52, %v582_v54  ;;  %v590_v63 = vmax.f32 %v588_v53, %v589_v55  ;;  %v610_v0 = vrot.slane %v609_v61, 4  ;;  %v616_v1 = vsel %vm231_vm0, %v563_v17, -inf  ;;  %v2171_v53 = vld [vmem:[%s2320_s13 + $0x48] sm:$0xff] }
  0x4e   : > { %v577_v3 = vrot.slane %v576_v58, 2  ;;  %v597_v4 = vmax.f32 %v595_v56, %v596_v59  ;;  %v604_v6 = vmax.f32 %v602_v57, %v603_v60  ;;  %v617_v8 = vrot.slane %v616_v1, 4 }
  0x4f   : > { %v584_v10 = vrot.slane %v583_v62, 2  ;;  %v591_v14 = vrot.slane %v590_v63, 2  ;;  %v611_v18 = vmax.f32 %v609_v61, %v610_v0  ;;  %v623_v20 = vsel %vm231_vm0, %v565_v35, -inf }
  0x50   : > { %v578_v21 = vmax.f32 %v576_v58, %v577_v3  ;;  %v598_v22 = vrot.slane %v597_v4, 2  ;;  %v605_v26 = vrot.slane %v604_v6, 2  ;;  %v618_v27 = vmax.f32 %v616_v1, %v617_v8 }
  0x51   : > { %v585_v28 = vmax.f32 %v583_v62, %v584_v10  ;;  %v592_v29 = vmax.f32 %v590_v63, %v591_v14  ;;  %v612_v30 = vrot.slane %v611_v18, 2  ;;  %v624_v31 = vrot.slane %v623_v20, 4 }
  0x52   : > { %v579_v32 = vrot.slane %v578_v21, 1  ;;  %v599_v13 = vmax.f32 %v597_v4, %v598_v22  ;;  %v606_v16 = vmax.f32 %v604_v6, %v605_v26  ;;  %v619_v34 = vrot.slane %v618_v27, 2 }
  0x53   : > { %v586_v15 = vrot.slane %v585_v28, 1  ;;  %v593_v36 = vrot.slane %v592_v29, 1  ;;  %v613_v11 = vmax.f32 %v611_v18, %v612_v30  ;;  %v625_v25 = vmax.f32 %v623_v20, %v624_v31 }
  0x54   : > { %v580_v37 = vmax.f32 %v578_v21, %v579_v32  ;;  %v600_v38 = vrot.slane %v599_v13, 1  ;;  %v607_v39 = vrot.slane %v606_v16, 1  ;;  %v620_v40 = vmax.f32 %v618_v27, %v619_v34 }
  0x55   : > { %v587_v23 = vmax.f32 %v585_v28, %v586_v15  ;;  %v594_v41 = vmax.f32 %v592_v29, %v593_v36  ;;  %v614_v42 = vrot.slane %v613_v11, 1  ;;  %v626_v43 = vrot.slane %v625_v25, 2 }
  0x56   : > { %v601_v44 = vmax.f32 %v599_v13, %v600_v38  ;;  %v608_v17 = vmax.f32 %v606_v16, %v607_v39  ;;  %v621_v45 = vrot.slane %v620_v40, 1  ;;  %v630_v49 = vmax.f32 %v2429_v33, %v580_v37 }
  0x57   : > { %v615_v50 = vmax.f32 %v613_v11, %v614_v42  ;;  %v627_v35 = vmax.f32 %v625_v25, %v626_v43  ;;  %v631_v51 = vmax.f32 %v2432_v2, %v587_v23  ;;  %v632_v52 = vmax.f32 %v2434_v7, %v594_v41 }
  0x58   : > { %v622_v54 = vmax.f32 %v620_v40, %v621_v45  ;;  %v633_v55 = vmax.f32 %v2436_v19, %v601_v44  ;;  %v634_v56 = vmax.f32 %v2441_v9, %v608_v17  ;;  %v668_v57 = vrot.slane %v2439_v24, %v2322_v5 }
  0x59   : > { %v628_v58 = vrot.slane %v627_v35, 1  ;;  %v635_v59 = vmax.f32 %v2443_v12, %v615_v50  ;;  %v646_v33 = vsel %vm407_vm1, %v631_v51, %v630_v49  ;;  %v675_v2 = vrot.slane %v661_v46, %v2322_v5  ;;  %v2172_v51 = vld [vmem:[%s2320_s13 + $0x50] sm:$0xff] }
  0x5a   : > { %v636_v7 = vmax.f32 %v2452_v47, %v622_v54  ;;  %v647_v60 = vsel %vm409_vm2, %v632_v52, %v646_v33  ;;  %v676_v19 = vcombine.high %v668_v57, %v668_v57  ;;  %v678_v61 = vcombine.high %v2171_v53, %v2171_v53  ;;  %v2173_v33 = vld [vmem:[%s2320_s13 + $0x58] sm:$0xff] }
  0x5b   : > { %v629_v9 = vmax.f32 %v627_v35, %v628_v58  ;;  %v648_v62 = vsel %vm411_vm3, %v633_v55, %v647_v60  ;;  %v677_v63 = vcombine.high %v675_v2, %v675_v2  ;;  %v685_v0 = vrot.slane %v2171_v53, %v2322_v5 }
  0x5c   : > { %v649_v12 = vsel %vm413_vm4, %v634_v56, %v648_v62  ;;  %v692_v1 = vrot.slane %v678_v61, %v2322_v5  ;;  %v703_v24 = vsel %vm231_vm0, %v668_v57, -inf  ;;  %v710_v46 = vsel %vm231_vm0, %v676_v19, -inf }
  0x5d   : > { %v637_v47 = vmax.f32 %v2454_v48, %v629_v9  ;;  %v650_v3 = vsel %vm415_vm5, %v635_v59, %v649_v12  ;;  %v693_v4 = vcombine.high %v685_v0, %v685_v0  ;;  %v704_v6 = vrot.slane %v703_v24, 4 }
  0x5e   : > { %v651_v8 = vsel %vm417_vm6, %v636_v7, %v650_v3  ;;  %v694_v10 = vcombine.high %v692_v1, %v692_v1  ;;  %v711_v14 = vrot.slane %v710_v46, 4  ;;  %v717_v18 = vsel %vm231_vm0, %v675_v2, -inf }
  0x5f   : > { %v652_v20 = vsel %vm419_vm7, %v637_v47, %v651_v8  ;;  %v705_v21 = vmax.f32 %v703_v24, %v704_v6  ;;  %v718_v22 = vrot.slane %v717_v18, 4  ;;  %v724_v26 = vsel %vm231_vm0, %v677_v63, -inf }
  0x60   : > { %2169 = vst.msk [vmem:[%s2413_s17 + $0x8] sm:$0xff] %vm422_vm8, %v652_v20  ;;  %v712_v27 = vmax.f32 %v710_v46, %v711_v14  ;;  %v725_v48 = vrot.slane %v724_v26, 4  ;;  %v731_v28 = vsel %vm231_vm0, %v685_v0, -inf  ;;  %v738_v29 = vsel %vm231_vm0, %v693_v4, -inf }
  0x61   : > { %v706_v30 = vrot.slane %v705_v21, 2  ;;  %v719_v31 = vmax.f32 %v717_v18, %v718_v22  ;;  %v732_v32 = vrot.slane %v731_v28, 4  ;;  %v739_v13 = vrot.slane %v738_v29, 4 }
  0x62   : > { %v713_v16 = vrot.slane %v712_v27, 2  ;;  %v726_v34 = vmax.f32 %v724_v26, %v725_v48  ;;  %v745_v15 = vsel %vm231_vm0, %v692_v1, -inf  ;;  %v752_v36 = vsel %vm231_vm0, %v694_v10, -inf }
  0x63   : > { %v707_v11 = vmax.f32 %v705_v21, %v706_v30  ;;  %v720_v25 = vrot.slane %v719_v31, 2  ;;  %v733_v37 = vmax.f32 %v731_v28, %v732_v32  ;;  %v740_v38 = vmax.f32 %v738_v29, %v739_v13 }
  0x64   : > { %v714_v39 = vmax.f32 %v712_v27, %v713_v16  ;;  %v727_v40 = vrot.slane %v726_v34, 2  ;;  %v746_v23 = vrot.slane %v745_v15, 4  ;;  %v753_v41 = vrot.slane %v752_v36, 4 }
  0x65   : > { %v708_v42 = vrot.slane %v707_v11, 1  ;;  %v721_v43 = vmax.f32 %v719_v31, %v720_v25  ;;  %v734_v44 = vrot.slane %v733_v37, 2  ;;  %v741_v17 = vrot.slane %v740_v38, 2 }
  0x66   : > { %v715_v45 = vrot.slane %v714_v39, 1  ;;  %v728_v49 = vmax.f32 %v726_v34, %v727_v40  ;;  %v747_v50 = vmax.f32 %v745_v15, %v746_v23  ;;  %v754_v35 = vmax.f32 %v752_v36, %v753_v41 }
  0x67   : > { %v2498_v52 = vmax.f32 %v707_v11, %v708_v42  ;;  %v722_v53 = vrot.slane %v721_v43, 1  ;;  %v735_v54 = vmax.f32 %v733_v37, %v734_v44  ;;  %v742_v55 = vmax.f32 %v740_v38, %v741_v17 }
  0x68   : > { %v2500_v56 = vmax.f32 %v714_v39, %v715_v45  ;;  %v729_v57 = vrot.slane %v728_v49, 1  ;;  %v748_v58 = vrot.slane %v747_v50, 2  ;;  %v755_v59 = vrot.slane %v754_v35, 2 }
  0x69   : > { %v2503_v2 = vmax.f32 %v721_v43, %v722_v53  ;;  %v736_v7 = vrot.slane %v735_v54, 1  ;;  %v743_v60 = vrot.slane %v742_v55, 1  ;;  %v764_v19 = vcombine.high %v2172_v51, %v2172_v51 }
  0x6a   : > { %v2505_v61 = vmax.f32 %v728_v49, %v729_v57  ;;  %v749_v9 = vmax.f32 %v747_v50, %v748_v58  ;;  %v756_v62 = vmax.f32 %v754_v35, %v755_v59  ;;  %v771_v63 = vrot.slane %v2172_v51, %v2322_v5 }
  0x6b   : > { %v2508_v0 = vmax.f32 %v735_v54, %v736_v7  ;;  %v2510_v12 = vmax.f32 %v742_v55, %v743_v60  ;;  %v778_v1 = vrot.slane %v764_v19, %v2322_v5  ;;  %v781_v24 = vcombine.high %v2173_v33, %v2173_v33 }
  0x6c   : > { %v750_v46 = vrot.slane %v749_v9, 1  ;;  %v757_v47 = vrot.slane %v756_v62, 1  ;;  %v779_v3 = vcombine.high %v771_v63, %v771_v63  ;;  %v788_v4 = vrot.slane %v2173_v33, %v2322_v5 }
  0x6d   : > { %v780_v6 = vcombine.high %v778_v1, %v778_v1  ;;  %v795_v8 = vrot.slane %v781_v24, %v2322_v5  ;;  %v806_v10 = vsel %vm231_vm0, %v771_v63, -inf  ;;  %v820_v14 = vsel %vm231_vm0, %v778_v1, -inf  ;;  %v2175_v24 = vld [vmem:[%s2320_s13 + $0x60] sm:$0xff] }
  0x6e   : > { %v2517_v18 = vmax.f32 %v749_v9, %v750_v46  ;;  %v2519_v20 = vmax.f32 %v756_v62, %v757_v47  ;;  %v796_v21 = vcombine.high %v788_v4, %v788_v4  ;;  %v807_v22 = vrot.slane %v806_v10, 4 }
  0x6f   : > { %v797_v26 = vcombine.high %v795_v8, %v795_v8  ;;  %v813_v27 = vsel %vm231_vm0, %v779_v3, -inf  ;;  %v821_v48 = vrot.slane %v820_v14, 4  ;;  %v827_v28 = vsel %vm231_vm0, %v780_v6, -inf }
  0x70   : > { %v808_v29 = vmax.f32 %v806_v10, %v807_v22  ;;  %v814_v30 = vrot.slane %v813_v27, 4  ;;  %v828_v31 = vrot.slane %v827_v28, 4  ;;  %v834_v32 = vsel %vm231_vm0, %v788_v4, -inf }
  0x71   : > { %v822_v13 = vmax.f32 %v820_v14, %v821_v48  ;;  %v835_v16 = vrot.slane %v834_v32, 4  ;;  %v841_v34 = vsel %vm231_vm0, %v796_v21, -inf  ;;  %v848_v15 = vsel %vm231_vm0, %v795_v8, -inf  ;;  %v2176_v21 = vld [vmem:[%s2320_s13 + $0x68] sm:$0xff] }
  0x72   : > { %v809_v36 = vrot.slane %v808_v29, 2  ;;  %v815_v11 = vmax.f32 %v813_v27, %v814_v30  ;;  %v829_v25 = vmax.f32 %v827_v28, %v828_v31  ;;  %v842_v37 = vrot.slane %v841_v34, 4 }
  0x73   : > { %v823_v38 = vrot.slane %v822_v13, 2  ;;  %v836_v39 = vmax.f32 %v834_v32, %v835_v16  ;;  %v849_v40 = vrot.slane %v848_v15, 4  ;;  %v855_v23 = vsel %vm231_vm0, %v797_v26, -inf }
  0x74   : > { %v810_v41 = vmax.f32 %v808_v29, %v809_v36  ;;  %v816_v42 = vrot.slane %v815_v11, 2  ;;  %v830_v43 = vrot.slane %v829_v25, 2  ;;  %v843_v44 = vmax.f32 %v841_v34, %v842_v37 }
  0x75   : > { %v824_v17 = vmax.f32 %v822_v13, %v823_v38  ;;  %v837_v45 = vrot.slane %v836_v39, 2  ;;  %v850_v49 = vmax.f32 %v848_v15, %v849_v40  ;;  %v856_v50 = vrot.slane %v855_v23, 4 }
  0x76   : > { %v811_v35 = vrot.slane %v810_v41, 1  ;;  %v817_v51 = vmax.f32 %v815_v11, %v816_v42  ;;  %v831_v53 = vmax.f32 %v829_v25, %v830_v43  ;;  %v844_v54 = vrot.slane %v843_v44, 2 }
  0x77   : > { %v825_v55 = vrot.slane %v824_v17, 1  ;;  %v838_v57 = vmax.f32 %v836_v39, %v837_v45  ;;  %v851_v58 = vrot.slane %v850_v49, 2  ;;  %v857_v59 = vmax.f32 %v855_v23, %v856_v50 }
  0x78   : > { %v812_v33 = vmax.f32 %v810_v41, %v811_v35  ;;  %v818_v7 = vrot.slane %v817_v51, 1  ;;  %v832_v60 = vrot.slane %v831_v53, 1  ;;  %v845_v19 = vmax.f32 %v843_v44, %v844_v54 }
  0x79   : > { %v826_v9 = vmax.f32 %v824_v17, %v825_v55  ;;  %v839_v62 = vrot.slane %v838_v57, 1  ;;  %v852_v63 = vmax.f32 %v850_v49, %v851_v58  ;;  %v858_v1 = vrot.slane %v857_v59, 2 }
  0x7a   : > { %v819_v46 = vmax.f32 %v817_v51, %v818_v7  ;;  %v833_v47 = vmax.f32 %v831_v53, %v832_v60  ;;  %v846_v3 = vrot.slane %v845_v19, 1  ;;  %v862_v4 = vmax.f32 %v2498_v52, %v812_v33 }
  0x7b   : > { %v840_v6 = vmax.f32 %v838_v57, %v839_v62  ;;  %v853_v8 = vrot.slane %v852_v63, 1  ;;  %v859_v10 = vmax.f32 %v857_v59, %v858_v1  ;;  %v864_v14 = vmax.f32 %v2503_v2, %v826_v9 }
  0x7c   : > { %v847_v22 = vmax.f32 %v845_v19, %v846_v3  ;;  %v863_v26 = vmax.f32 %v2500_v56, %v819_v46  ;;  %v865_v27 = vmax.f32 %v2505_v61, %v833_v47  ;;  %v893_v48 = vcombine.high %v2175_v24, %v2175_v24 }
  0x7d   : > { %v854_v28 = vmax.f32 %v852_v63, %v853_v8  ;;  %v860_v29 = vrot.slane %v859_v10, 1  ;;  %v866_v30 = vmax.f32 %v2508_v0, %v840_v6  ;;  %v900_v31 = vrot.slane %v2175_v24, %v2322_v5 }
  0x7e   : > { %v867_v52 = vmax.f32 %v2510_v12, %v847_v22  ;;  %v878_v32 = vsel %vm407_vm1, %v863_v26, %v862_v4  ;;  %v907_v13 = vrot.slane %v893_v48, %v2322_v5  ;;  %v910_v2 = vcombine.high %v2176_v21, %v2176_v21  ;;  %v2177_v26 = vld [vmem:[%s2320_s13 + $0x70] sm:$0xff] }
  0x7f   : > { %v861_v16 = vmax.f32 %v859_v10, %v860_v29  ;;  %v868_v34 = vmax.f32 %v2517_v18, %v854_v28  ;;  %v879_v56 = vsel %vm409_vm2, %v864_v14, %v878_v32  ;;  %v908_v61 = vcombine.high %v900_v31, %v900_v31 }
  0x80   : > { %v880_v15 = vsel %vm411_vm3, %v865_v27, %v879_v56  ;;  %v909_v36 = vcombine.high %v907_v13, %v907_v13  ;;  %v917_v0 = vrot.slane %v2176_v21, %v2322_v5  ;;  %v924_v11 = vrot.slane %v910_v2, %v2322_v5 }
  0x81   : > { %v869_v12 = vmax.f32 %v2519_v20, %v861_v16  ;;  %v881_v25 = vsel %vm413_vm4, %v866_v30, %v880_v15  ;;  %v935_v37 = vsel %vm231_vm0, %v900_v31, -inf  ;;  %v942_v38 = vsel %vm231_vm0, %v908_v61, -inf }
  0x82   : > { %v882_v18 = vsel %vm415_vm5, %v867_v52, %v881_v25  ;;  %v925_v39 = vcombine.high %v917_v0, %v917_v0  ;;  %v926_v40 = vcombine.high %v924_v11, %v924_v11  ;;  %v936_v23 = vrot.slane %v935_v37, 4 }
  0x83   : > { %v883_v41 = vsel %vm417_vm6, %v868_v34, %v882_v18  ;;  %v943_v42 = vrot.slane %v942_v38, 4  ;;  %v949_v43 = vsel %vm231_vm0, %v907_v13, -inf  ;;  %v956_v44 = vsel %vm231_vm0, %v909_v36, -inf  ;;  %v2178_v13 = vld [vmem:[%s2320_s13 + $0x78] sm:$0xff] }
  0x84   : > { %v884_v20 = vsel %vm419_vm7, %v869_v12, %v883_v41  ;;  %v937_v17 = vmax.f32 %v935_v37, %v936_v23  ;;  %v950_v45 = vrot.slane %v949_v43, 4  ;;  %v957_v49 = vrot.slane %v956_v44, 4 }
  0x85   : > { %2174 = vst.msk [vmem:[%s2413_s17 + $0x10] sm:$0xff] %vm422_vm8, %v884_v20  ;;  %v944_v50 = vmax.f32 %v942_v38, %v943_v42  ;;  %v963_v35 = vsel %vm231_vm0, %v917_v0, -inf  ;;  %v970_v51 = vsel %vm231_vm0, %v925_v39, -inf  ;;  %v977_v53 = vsel %vm231_vm0, %v924_v11, -inf }
  0x86   : > { %v938_v54 = vrot.slane %v937_v17, 2  ;;  %v951_v55 = vmax.f32 %v949_v43, %v950_v45  ;;  %v958_v57 = vmax.f32 %v956_v44, %v957_v49  ;;  %v964_v58 = vrot.slane %v963_v35, 4 }
  0x87   : > { %v945_v59 = vrot.slane %v944_v50, 2  ;;  %v971_v33 = vrot.slane %v970_v51, 4  ;;  %v978_v7 = vrot.slane %v977_v53, 4  ;;  %v984_v60 = vsel %vm231_vm0, %v926_v40, -inf }
  0x88   : > { %v939_v19 = vmax.f32 %v937_v17, %v938_v54  ;;  %v952_v9 = vrot.slane %v951_v55, 2  ;;  %v959_v62 = vrot.slane %v958_v57, 2  ;;  %v965_v63 = vmax.f32 %v963_v35, %v964_v58 }
  0x89   : > { %v946_v1 = vmax.f32 %v944_v50, %v945_v59  ;;  %v972_v24 = vmax.f32 %v970_v51, %v971_v33  ;;  %v979_v46 = vmax.f32 %v977_v53, %v978_v7  ;;  %v985_v47 = vrot.slane %v984_v60, 4 }
  0x8a   : > { %v940_v3 = vrot.slane %v939_v19, 1  ;;  %v953_v4 = vmax.f32 %v951_v55, %v952_v9  ;;  %v960_v6 = vmax.f32 %v958_v57, %v959_v62  ;;  %v966_v8 = vrot.slane %v965_v63, 2 }
  0x8b   : > { %v947_v10 = vrot.slane %v946_v1, 1  ;;  %v973_v14 = vrot.slane %v972_v24, 2  ;;  %v980_v21 = vrot.slane %v979_v46, 2  ;;  %v986_v22 = vmax.f32 %v984_v60, %v985_v47 }
  0x8c   : > { %v2559_v27 = vmax.f32 %v939_v19, %v940_v3  ;;  %v954_v48 = vrot.slane %v953_v4, 1  ;;  %v961_v28 = vrot.slane %v960_v6, 1  ;;  %v967_v29 = vmax.f32 %v965_v63, %v966_v8 }
  0x8d   : > { %v2561_v30 = vmax.f32 %v946_v1, %v947_v10  ;;  %v974_v31 = vmax.f32 %v972_v24, %v973_v14  ;;  %v981_v52 = vmax.f32 %v979_v46, %v980_v21  ;;  %v987_v32 = vrot.slane %v986_v22, 2 }
  0x8e   : > { %v2564_v2 = vmax.f32 %v953_v4, %v954_v48  ;;  %v2566_v16 = vmax.f32 %v960_v6, %v961_v28  ;;  %v968_v34 = vrot.slane %v967_v29, 1  ;;  %v996_v56 = vcombine.high %v2177_v26, %v2177_v26 }
  0x8f   : > { %v975_v61 = vrot.slane %v974_v31, 1  ;;  %v982_v15 = vrot.slane %v981_v52, 1  ;;  %v988_v36 = vmax.f32 %v986_v22, %v987_v32  ;;  %v1003_v0 = vrot.slane %v2177_v26, %v2322_v5 }
  0x90   : > { %v2569_v11 = vmax.f32 %v967_v29, %v968_v34  ;;  %v1010_v12 = vrot.slane %v996_v56, %v2322_v5  ;;  %v1013_v25 = vcombine.high %v2178_v13, %v2178_v13  ;;  %v1020_v37 = vrot.slane %v2178_v13, %v2322_v5 }
  0x91   : > { %v2573_v38 = vmax.f32 %v974_v31, %v975_v61  ;;  %v2575_v18 = vmax.f32 %v981_v52, %v982_v15  ;;  %v989_v39 = vrot.slane %v988_v36, 1  ;;  %v1011_v40 = vcombine.high %v1003_v0, %v1003_v0 }
  0x92   : > { %v1012_v23 = vcombine.high %v1010_v12, %v1010_v12  ;;  %v1027_v41 = vrot.slane %v1013_v25, %v2322_v5  ;;  %v1028_v42 = vcombine.high %v1020_v37, %v1020_v37  ;;  %v1038_v43 = vsel %vm231_vm0, %v1003_v0, -inf  ;;  %v2180_v25 = vld [vmem:[%s2320_s13 + $0x80] sm:$0xff] }
  0x93   : > { %v2579_v44 = vmax.f32 %v988_v36, %v989_v39  ;;  %v1039_v20 = vrot.slane %v1038_v43, 4  ;;  %v1045_v17 = vsel %vm231_vm0, %v1011_v40, -inf  ;;  %v1052_v45 = vsel %vm231_vm0, %v1010_v12, -inf }
  0x94   : > { %v1029_v49 = vcombine.high %v1027_v41, %v1027_v41  ;;  %v1046_v50 = vrot.slane %v1045_v17, 4  ;;  %v1053_v35 = vrot.slane %v1052_v45, 4  ;;  %v1059_v51 = vsel %vm231_vm0, %v1012_v23, -inf }
  0x95   : > { %v1040_v53 = vmax.f32 %v1038_v43, %v1039_v20  ;;  %v1060_v54 = vrot.slane %v1059_v51, 4  ;;  %v1066_v55 = vsel %vm231_vm0, %v1020_v37, -inf  ;;  %v1073_v57 = vsel %vm231_vm0, %v1028_v42, -inf }
  0x96   : > { %v1047_v58 = vmax.f32 %v1045_v17, %v1046_v50  ;;  %v1054_v59 = vmax.f32 %v1052_v45, %v1053_v35  ;;  %v1067_v33 = vrot.slane %v1066_v55, 4  ;;  %v1074_v7 = vrot.slane %v1073_v57, 4  ;;  %v2181_v50 = vld [vmem:[%s2320_s13 + $0x88] sm:$0xff] }
  0x97   : > { %v1041_v60 = vrot.slane %v1040_v53, 2  ;;  %v1061_v19 = vmax.f32 %v1059_v51, %v1060_v54  ;;  %v1080_v9 = vsel %vm231_vm0, %v1027_v41, -inf  ;;  %v1087_v62 = vsel %vm231_vm0, %v1029_v49, -inf }
  0x98   : > { %v1048_v63 = vrot.slane %v1047_v58, 2  ;;  %v1055_v1 = vrot.slane %v1054_v59, 2  ;;  %v1068_v24 = vmax.f32 %v1066_v55, %v1067_v33  ;;  %v1075_v46 = vmax.f32 %v1073_v57, %v1074_v7 }
  0x99   : > { %v1042_v47 = vmax.f32 %v1040_v53, %v1041_v60  ;;  %v1062_v3 = vrot.slane %v1061_v19, 2  ;;  %v1081_v4 = vrot.slane %v1080_v9, 4  ;;  %v1088_v6 = vrot.slane %v1087_v62, 4 }
  0x9a   : > { %v1049_v8 = vmax.f32 %v1047_v58, %v1048_v63  ;;  %v1056_v10 = vmax.f32 %v1054_v59, %v1055_v1  ;;  %v1069_v14 = vrot.slane %v1068_v24, 2  ;;  %v1076_v21 = vrot.slane %v1075_v46, 2 }
  0x9b   : > { %v1043_v22 = vrot.slane %v1042_v47, 1  ;;  %v1063_v26 = vmax.f32 %v1061_v19, %v1062_v3  ;;  %v1082_v48 = vmax.f32 %v1080_v9, %v1081_v4  ;;  %v1089_v28 = vmax.f32 %v1087_v62, %v1088_v6 }
  0x9c   : > { %v1050_v29 = vrot.slane %v1049_v8, 1  ;;  %v1057_v31 = vrot.slane %v1056_v10, 1  ;;  %v1070_v52 = vmax.f32 %v1068_v24, %v1069_v14  ;;  %v1077_v32 = vmax.f32 %v1075_v46, %v1076_v21 }
  0x9d   : > { %v1044_v13 = vmax.f32 %v1042_v47, %v1043_v22  ;;  %v1064_v34 = vrot.slane %v1063_v26, 1  ;;  %v1083_v56 = vrot.slane %v1082_v48, 2  ;;  %v1090_v61 = vrot.slane %v1089_v28, 2 }
  0x9e   : > { %v1051_v15 = vmax.f32 %v1049_v8, %v1050_v29  ;;  %v1058_v36 = vmax.f32 %v1056_v10, %v1057_v31  ;;  %v1071_v0 = vrot.slane %v1070_v52, 1  ;;  %v1078_v12 = vrot.slane %v1077_v32, 1 }
  0x9f   : > { %v1065_v37 = vmax.f32 %v1063_v26, %v1064_v34  ;;  %v1084_v39 = vmax.f32 %v1082_v48, %v1083_v56  ;;  %v1091_v40 = vmax.f32 %v1089_v28, %v1090_v61  ;;  %v1094_v23 = vmax.f32 %v2559_v27, %v1044_v13 }
  0xa0   : > { %v1072_v41 = vmax.f32 %v1070_v52, %v1071_v0  ;;  %v1079_v42 = vmax.f32 %v1077_v32, %v1078_v12  ;;  %v1095_v43 = vmax.f32 %v2561_v30, %v1051_v15  ;;  %v1096_v20 = vmax.f32 %v2564_v2, %v1058_v36 }
  0xa1   : > { %v1085_v17 = vrot.slane %v1084_v39, 1  ;;  %v1092_v45 = vrot.slane %v1091_v40, 1  ;;  %v1097_v49 = vmax.f32 %v2566_v16, %v1065_v37  ;;  %v1125_v35 = vcombine.high %v2180_v25, %v2180_v25 }
  0xa2   : > { %v1098_v51 = vmax.f32 %v2569_v11, %v1072_v41  ;;  %v1099_v53 = vmax.f32 %v2573_v38, %v1079_v42  ;;  %v1110_v54 = vsel %vm407_vm1, %v1095_v43, %v1094_v23  ;;  %v1132_v27 = vrot.slane %v2180_v25, %v2322_v5 }
  0xa3   : > { %v1086_v55 = vmax.f32 %v1084_v39, %v1085_v17  ;;  %v1093_v57 = vmax.f32 %v1091_v40, %v1092_v45  ;;  %v1111_v30 = vsel %vm409_vm2, %v1096_v20, %v1110_v54  ;;  %v1139_v2 = vrot.slane %v1125_v35, %v2322_v5  ;;  %v2183_v54 = vld [vmem:[%s2320_s13 + $0x98] sm:$0xff] }
  0xa4   : > { %v1112_v58 = vsel %vm411_vm3, %v1097_v49, %v1111_v30  ;;  %v1140_v59 = vcombine.high %v1132_v27, %v1132_v27  ;;  %v1142_v16 = vcombine.high %v2181_v50, %v2181_v50  ;;  %v1149_v33 = vrot.slane %v2181_v50, %v2322_v5  ;;  %v2182_v49 = vld [vmem:[%s2320_s13 + $0x90] sm:$0xff] }
  0xa5   : > { %v1100_v11 = vmax.f32 %v2575_v18, %v1086_v55  ;;  %v1101_v38 = vmax.f32 %v2579_v44, %v1093_v57  ;;  %v1113_v7 = vsel %vm413_vm4, %v1098_v51, %v1112_v58  ;;  %v1141_v60 = vcombine.high %v1139_v2, %v1139_v2 }
  0xa6   : > { %v1114_v19 = vsel %vm415_vm5, %v1099_v53, %v1113_v7  ;;  %v1156_v9 = vrot.slane %v1142_v16, %v2322_v5  ;;  %v1157_v62 = vcombine.high %v1149_v33, %v1149_v33  ;;  %v1167_v63 = vsel %vm231_vm0, %v1132_v27, -inf }
  0xa7   : > { %v1115_v1 = vsel %vm417_vm6, %v1100_v11, %v1114_v19  ;;  %v1168_v24 = vrot.slane %v1167_v63, 4  ;;  %v1174_v46 = vsel %vm231_vm0, %v1140_v59, -inf  ;;  %v1181_v18 = vsel %vm231_vm0, %v1139_v2, -inf }
  0xa8   : > { %v1116_v47 = vsel %vm419_vm7, %v1101_v38, %v1115_v1  ;;  %v1158_v44 = vcombine.high %v1156_v9, %v1156_v9  ;;  %v1175_v3 = vrot.slane %v1174_v46, 4  ;;  %v1182_v4 = vrot.slane %v1181_v18, 4 }
  0xa9   : > { %2179 = vst.msk [vmem:[%s2413_s17 + $0x18] sm:$0xff] %vm422_vm8, %v1116_v47  ;;  %v1169_v6 = vmax.f32 %v1167_v63, %v1168_v24  ;;  %v1188_v8 = vsel %vm231_vm0, %v1141_v60, -inf  ;;  %v1195_v10 = vsel %vm231_vm0, %v1149_v33, -inf  ;;  %v1202_v14 = vsel %vm231_vm0, %v1157_v62, -inf }
  0xaa   : > { %v1176_v21 = vmax.f32 %v1174_v46, %v1175_v3  ;;  %v1183_v22 = vmax.f32 %v1181_v18, %v1182_v4  ;;  %v1189_v26 = vrot.slane %v1188_v8, 4  ;;  %v1196_v48 = vrot.slane %v1195_v10, 4 }
  0xab   : > { %v1170_v28 = vrot.slane %v1169_v6, 2  ;;  %v1203_v29 = vrot.slane %v1202_v14, 4  ;;  %v1209_v31 = vsel %vm231_vm0, %v1156_v9, -inf  ;;  %v1216_v52 = vsel %vm231_vm0, %v1158_v44, -inf }
  0xac   : > { %v1177_v32 = vrot.slane %v1176_v21, 2  ;;  %v1184_v13 = vrot.slane %v1183_v22, 2  ;;  %v1190_v34 = vmax.f32 %v1188_v8, %v1189_v26  ;;  %v1197_v56 = vmax.f32 %v1195_v10, %v1196_v48 }
  0xad   : > { %v1171_v61 = vmax.f32 %v1169_v6, %v1170_v28  ;;  %v1204_v15 = vmax.f32 %v1202_v14, %v1203_v29  ;;  %v1210_v36 = vrot.slane %v1209_v31, 4  ;;  %v1217_v0 = vrot.slane %v1216_v52, 4 }
  0xae   : > { %v1178_v12 = vmax.f32 %v1176_v21, %v1177_v32  ;;  %v1185_v25 = vmax.f32 %v1183_v22, %v1184_v13  ;;  %v1191_v37 = vrot.slane %v1190_v34, 2  ;;  %v1198_v39 = vrot.slane %v1197_v56, 2 }
  0xaf   : > { %v1172_v40 = vrot.slane %v1171_v61, 1  ;;  %v1205_v23 = vrot.slane %v1204_v15, 2  ;;  %v1211_v41 = vmax.f32 %v1209_v31, %v1210_v36  ;;  %v1218_v42 = vmax.f32 %v1216_v52, %v1217_v0 }
  0xb0   : > { %v1179_v43 = vrot.slane %v1178_v12, 1  ;;  %v1186_v20 = vrot.slane %v1185_v25, 1  ;;  %v1192_v17 = vmax.f32 %v1190_v34, %v1191_v37  ;;  %v1199_v45 = vmax.f32 %v1197_v56, %v1198_v39 }
  0xb1   : > { %v2620_v50 = vmax.f32 %v1171_v61, %v1172_v40  ;;  %v1206_v35 = vmax.f32 %v1204_v15, %v1205_v23  ;;  %v1212_v51 = vrot.slane %v1211_v41, 2  ;;  %v1219_v53 = vrot.slane %v1218_v42, 2 }
  0xb2   : > { %v2623_v27 = vmax.f32 %v1178_v12, %v1179_v43  ;;  %v2625_v55 = vmax.f32 %v1185_v25, %v1186_v20  ;;  %v1193_v57 = vrot.slane %v1192_v17, 1  ;;  %v1200_v30 = vrot.slane %v1199_v45, 1 }
  0xb3   : > { %v1207_v2 = vrot.slane %v1206_v35, 1  ;;  %v1213_v58 = vmax.f32 %v1211_v41, %v1212_v51  ;;  %v1220_v59 = vmax.f32 %v1218_v42, %v1219_v53  ;;  %v1228_v16 = vcombine.high %v2182_v49, %v2182_v49 }
  0xb4   : > { %v2627_v33 = vmax.f32 %v1192_v17, %v1193_v57  ;;  %v2629_v11 = vmax.f32 %v1199_v45, %v1200_v30  ;;  %v1235_v38 = vrot.slane %v2182_v49, %v2322_v5  ;;  %v1245_v7 = vcombine.high %v2183_v54, %v2183_v54 }
  0xb5   : > { %v2632_v60 = vmax.f32 %v1206_v35, %v1207_v2  ;;  %v1214_v19 = vrot.slane %v1213_v58, 1  ;;  %v1221_v9 = vrot.slane %v1220_v59, 1  ;;  %v1242_v62 = vrot.slane %v1228_v16, %v2322_v5 }
  0xb6   : > { %v1243_v63 = vcombine.high %v1235_v38, %v1235_v38  ;;  %v1252_v1 = vrot.slane %v2183_v54, %v2322_v5  ;;  %v1259_v24 = vrot.slane %v1245_v7, %v2322_v5  ;;  %v1270_v46 = vsel %vm231_vm0, %v1235_v38, -inf  ;;  %v2185_v38 = vld [vmem:[%s2320_s13 + $0xa0] sm:$0xff] }
  0xb7   : > { %v2638_v18 = vmax.f32 %v1213_v58, %v1214_v19  ;;  %v2640_v47 = vmax.f32 %v1220_v59, %v1221_v9  ;;  %v1244_v44 = vcombine.high %v1242_v62, %v1242_v62  ;;  %v1271_v3 = vrot.slane %v1270_v46, 4 }
  0xb8   : > { %v1260_v4 = vcombine.high %v1252_v1, %v1252_v1  ;;  %v1261_v6 = vcombine.high %v1259_v24, %v1259_v24  ;;  %v1277_v8 = vsel %vm231_vm0, %v1243_v63, -inf  ;;  %v1284_v10 = vsel %vm231_vm0, %v1242_v62, -inf }
  0xb9   : > { %v1272_v14 = vmax.f32 %v1270_v46, %v1271_v3  ;;  %v1278_v21 = vrot.slane %v1277_v8, 4  ;;  %v1285_v22 = vrot.slane %v1284_v10, 4  ;;  %v1291_v26 = vsel %vm231_vm0, %v1244_v44, -inf }
  0xba   : > { %v1292_v48 = vrot.slane %v1291_v26, 4  ;;  %v1298_v28 = vsel %vm231_vm0, %v1252_v1, -inf  ;;  %v1305_v29 = vsel %vm231_vm0, %v1260_v4, -inf  ;;  %v1312_v31 = vsel %vm231_vm0, %v1259_v24, -inf }
  0xbb   : > { %v1273_v52 = vrot.slane %v1272_v14, 2  ;;  %v1279_v32 = vmax.f32 %v1277_v8, %v1278_v21  ;;  %v1286_v13 = vmax.f32 %v1284_v10, %v1285_v22  ;;  %v1299_v34 = vrot.slane %v1298_v28, 4  ;;  %v2186_v22 = vld [vmem:[%s2320_s13 + $0xa8] sm:$0xff] }
  0xbc   : > { %v1293_v56 = vmax.f32 %v1291_v26, %v1292_v48  ;;  %v1306_v61 = vrot.slane %v1305_v29, 4  ;;  %v1313_v15 = vrot.slane %v1312_v31, 4  ;;  %v1319_v36 = vsel %vm231_vm0, %v1261_v6, -inf }
  0xbd   : > { %v1274_v0 = vmax.f32 %v1272_v14, %v1273_v52  ;;  %v1280_v12 = vrot.slane %v1279_v32, 2  ;;  %v1287_v25 = vrot.slane %v1286_v13, 2  ;;  %v1300_v37 = vmax.f32 %v1298_v28, %v1299_v34 }
  0xbe   : > { %v1294_v39 = vrot.slane %v1293_v56, 2  ;;  %v1307_v40 = vmax.f32 %v1305_v29, %v1306_v61  ;;  %v1314_v23 = vmax.f32 %v1312_v31, %v1313_v15  ;;  %v1320_v41 = vrot.slane %v1319_v36, 4 }
  0xbf   : > { %v1275_v42 = vrot.slane %v1274_v0, 1  ;;  %v1281_v43 = vmax.f32 %v1279_v32, %v1280_v12  ;;  %v1288_v20 = vmax.f32 %v1286_v13, %v1287_v25  ;;  %v1301_v17 = vrot.slane %v1300_v37, 2 }
  0xc0   : > { %v1295_v45 = vmax.f32 %v1293_v56, %v1294_v39  ;;  %v1308_v49 = vrot.slane %v1307_v40, 2  ;;  %v1315_v35 = vrot.slane %v1314_v23, 2  ;;  %v1321_v51 = vmax.f32 %v1319_v36, %v1320_v41 }
  0xc1   : > { %v1276_v53 = vmax.f32 %v1274_v0, %v1275_v42  ;;  %v1282_v54 = vrot.slane %v1281_v43, 1  ;;  %v1289_v57 = vrot.slane %v1288_v20, 1  ;;  %v1302_v30 = vmax.f32 %v1300_v37, %v1301_v17 }
  0xc2   : > { %v1296_v2 = vrot.slane %v1295_v45, 1  ;;  %v1309_v58 = vmax.f32 %v1307_v40, %v1308_v49  ;;  %v1316_v59 = vmax.f32 %v1314_v23, %v1315_v35  ;;  %v1322_v16 = vrot.slane %v1321_v51, 2 }
  0xc3   : > { %v1283_v7 = vmax.f32 %v1281_v43, %v1282_v54  ;;  %v1290_v19 = vmax.f32 %v1288_v20, %v1289_v57  ;;  %v1303_v9 = vrot.slane %v1302_v30, 1  ;;  %v1326_v62 = vmax.f32 %v2620_v50, %v1276_v53 }
  0xc4   : > { %v1297_v63 = vmax.f32 %v1295_v45, %v1296_v2  ;;  %v1310_v1 = vrot.slane %v1309_v58, 1  ;;  %v1317_v24 = vrot.slane %v1316_v59, 1  ;;  %v1323_v46 = vmax.f32 %v1321_v51, %v1322_v16 }
  0xc5   : > { %v1304_v44 = vmax.f32 %v1302_v30, %v1303_v9  ;;  %v1327_v3 = vmax.f32 %v2623_v27, %v1283_v7  ;;  %v1328_v4 = vmax.f32 %v2625_v55, %v1290_v19  ;;  %v1357_v6 = vcombine.high %v2185_v38, %v2185_v38 }
  0xc6   : > { %v1311_v8 = vmax.f32 %v1309_v58, %v1310_v1  ;;  %v1318_v10 = vmax.f32 %v1316_v59, %v1317_v24  ;;  %v1324_v14 = vrot.slane %v1323_v46, 1  ;;  %v1329_v21 = vmax.f32 %v2627_v33, %v1297_v63 }
  0xc7   : > { %v1330_v26 = vmax.f32 %v2629_v11, %v1304_v44  ;;  %v1342_v50 = vsel %vm407_vm1, %v1327_v3, %v1326_v62  ;;  %v1364_v48 = vrot.slane %v2185_v38, %v2322_v5  ;;  %v1371_v28 = vrot.slane %v1357_v6, %v2322_v5 }
  0xc8   : > { %v1325_v29 = vmax.f32 %v1323_v46, %v1324_v14  ;;  %v1331_v27 = vmax.f32 %v2632_v60, %v1311_v8  ;;  %v1332_v55 = vmax.f32 %v2638_v18, %v1318_v10  ;;  %v1343_v31 = vsel %vm409_vm2, %v1328_v4, %v1342_v50  ;;  %v2187_v4 = vld [vmem:[%s2320_s13 + $0xb0] sm:$0xff] }
  0xc9   : > { %v1344_v52 = vsel %vm411_vm3, %v1329_v21, %v1343_v31  ;;  %v1372_v32 = vcombine.high %v1364_v48, %v1364_v48  ;;  %v1373_v33 = vcombine.high %v1371_v28, %v1371_v28  ;;  %v1374_v13 = vcombine.high %v2186_v22, %v2186_v22 }
  0xca   : > { %v1333_v11 = vmax.f32 %v2640_v47, %v1325_v29  ;;  %v1345_v34 = vsel %vm413_vm4, %v1330_v26, %v1344_v52  ;;  %v1381_v56 = vrot.slane %v2186_v22, %v2322_v5  ;;  %v1399_v61 = vsel %vm231_vm0, %v1364_v48, -inf  ;;  %v2188_v48 = vld [vmem:[%s2320_s13 + $0xb8] sm:$0xff] }
  0xcb   : > { %v1346_v60 = vsel %vm415_vm5, %v1331_v27, %v1345_v34  ;;  %v1388_v18 = vrot.slane %v1374_v13, %v2322_v5  ;;  %v1400_v15 = vrot.slane %v1399_v61, 4  ;;  %v1406_v36 = vsel %vm231_vm0, %v1372_v32, -inf }
  0xcc   : > { %v1347_v0 = vsel %vm417_vm6, %v1332_v55, %v1346_v60  ;;  %v1389_v12 = vcombine.high %v1381_v56, %v1381_v56  ;;  %v1407_v25 = vrot.slane %v1406_v36, 4  ;;  %v1413_v47 = vsel %vm231_vm0, %v1371_v28, -inf }
  0xcd   : > { %v1348_v37 = vsel %vm419_vm7, %v1333_v11, %v1347_v0  ;;  %v1390_v39 = vcombine.high %v1388_v18, %v1388_v18  ;;  %v1401_v40 = vmax.f32 %v1399_v61, %v1400_v15  ;;  %v1414_v23 = vrot.slane %v1413_v47, 4 }
  0xce   : > { %2184 = vst.msk [vmem:[%s2413_s17 + $0x20] sm:$0xff] %vm422_vm8, %v1348_v37  ;;  %v1408_v41 = vmax.f32 %v1406_v36, %v1407_v25  ;;  %v1420_v42 = vsel %vm231_vm0, %v1373_v33, -inf  ;;  %v1427_v43 = vsel %vm231_vm0, %v1381_v56, -inf  ;;  %v1434_v20 = vsel %vm231_vm0, %v1389_v12, -inf }
  0xcf   : > { %v1402_v17 = vrot.slane %v1401_v40, 2  ;;  %v1415_v45 = vmax.f32 %v1413_v47, %v1414_v23  ;;  %v1421_v49 = vrot.slane %v1420_v42, 4  ;;  %v1428_v35 = vrot.slane %v1427_v43, 4 }
  0xd0   : > { %v1409_v51 = vrot.slane %v1408_v41, 2  ;;  %v1435_v53 = vrot.slane %v1434_v20, 4  ;;  %v1441_v54 = vsel %vm231_vm0, %v1388_v18, -inf  ;;  %v1448_v57 = vsel %vm231_vm0, %v1390_v39, -inf }
  0xd1   : > { %v1403_v30 = vmax.f32 %v1401_v40, %v1402_v17  ;;  %v1416_v2 = vrot.slane %v1415_v45, 2  ;;  %v1422_v58 = vmax.f32 %v1420_v42, %v1421_v49  ;;  %v1429_v59 = vmax.f32 %v1427_v43, %v1428_v35 }
  0xd2   : > { %v1410_v16 = vmax.f32 %v1408_v41, %v1409_v51  ;;  %v1436_v38 = vmax.f32 %v1434_v20, %v1435_v53  ;;  %v1442_v7 = vrot.slane %v1441_v54, 4  ;;  %v1449_v19 = vrot.slane %v1448_v57, 4 }
  0xd3   : > { %v1404_v9 = vrot.slane %v1403_v30, 1  ;;  %v1417_v62 = vmax.f32 %v1415_v45, %v1416_v2  ;;  %v1423_v63 = vrot.slane %v1422_v58, 2  ;;  %v1430_v1 = vrot.slane %v1429_v59, 2 }
  0xd4   : > { %v1411_v24 = vrot.slane %v1410_v16, 1  ;;  %v1437_v46 = vrot.slane %v1436_v38, 2  ;;  %v1443_v44 = vmax.f32 %v1441_v54, %v1442_v7  ;;  %v1450_v3 = vmax.f32 %v1448_v57, %v1449_v19 }
  0xd5   : > { %v2681_v6 = vmax.f32 %v1403_v30, %v1404_v9  ;;  %v1418_v8 = vrot.slane %v1417_v62, 1  ;;  %v1424_v10 = vmax.f32 %v1422_v58, %v1423_v63  ;;  %v1431_v14 = vmax.f32 %v1429_v59, %v1430_v1 }
  0xd6   : > { %v2683_v21 = vmax.f32 %v1410_v16, %v1411_v24  ;;  %v1438_v22 = vmax.f32 %v1436_v38, %v1437_v46  ;;  %v1444_v26 = vrot.slane %v1443_v44, 2  ;;  %v1451_v50 = vrot.slane %v1450_v3, 2 }
  0xd7   : > { %v2686_v28 = vmax.f32 %v1417_v62, %v1418_v8  ;;  %v1425_v29 = vrot.slane %v1424_v10, 1  ;;  %v1432_v27 = vrot.slane %v1431_v14, 1  ;;  %v1460_v55 = vcombine.high %v2187_v4, %v2187_v4 }
  0xd8   : > { %v1439_v31 = vrot.slane %v1438_v22, 1  ;;  %v1445_v52 = vmax.f32 %v1443_v44, %v1444_v26  ;;  %v1452_v32 = vmax.f32 %v1450_v3, %v1451_v50  ;;  %v1467_v33 = vrot.slane %v2187_v4, %v2322_v5 }
  0xd9   : > { %v2689_v13 = vmax.f32 %v1424_v10, %v1425_v29  ;;  %v2691_v11 = vmax.f32 %v1431_v14, %v1432_v27  ;;  %v1474_v34 = vrot.slane %v1460_v55, %v2322_v5  ;;  %v1477_v56 = vcombine.high %v2188_v48, %v2188_v48 }
  0xda   : > { %v2694_v61 = vmax.f32 %v1438_v22, %v1439_v31  ;;  %v1446_v60 = vrot.slane %v1445_v52, 1  ;;  %v1453_v18 = vrot.slane %v1452_v32, 1  ;;  %v1475_v15 = vcombine.high %v1467_v33, %v1467_v33 }
  0xdb   : > { %v1476_v36 = vcombine.high %v1474_v34, %v1474_v34  ;;  %v1484_v0 = vrot.slane %v2188_v48, %v2322_v5  ;;  %v1491_v12 = vrot.slane %v1477_v56, %v2322_v5  ;;  %v1502_v25 = vsel %vm231_vm0, %v1467_v33, -inf }
  0xdc   : > { %v2699_v47 = vmax.f32 %v1445_v52, %v1446_v60  ;;  %v2701_v37 = vmax.f32 %v1452_v32, %v1453_v18  ;;  %v1503_v39 = vrot.slane %v1502_v25, 4  ;;  %v1509_v40 = vsel %vm231_vm0, %v1475_v15, -inf }
  0xdd   : > { %v1492_v23 = vcombine.high %v1484_v0, %v1484_v0  ;;  %v1493_v41 = vcombine.high %v1491_v12, %v1491_v12  ;;  %v1510_v42 = vrot.slane %v1509_v40, 4  ;;  %v1516_v43 = vsel %vm231_vm0, %v1474_v34, -inf  ;;  %v2190_v34 = vld [vmem:[%s2320_s13 + $0xc0] sm:$0xff] }
  0xde   : > { %v1504_v20 = vmax.f32 %v1502_v25, %v1503_v39  ;;  %v1517_v17 = vrot.slane %v1516_v43, 4  ;;  %v1523_v45 = vsel %vm231_vm0, %v1476_v36, -inf  ;;  %v1530_v49 = vsel %vm231_vm0, %v1484_v0, -inf }
  0xdf   : > { %v1511_v35 = vmax.f32 %v1509_v40, %v1510_v42  ;;  %v1524_v51 = vrot.slane %v1523_v45, 4  ;;  %v1531_v53 = vrot.slane %v1530_v49, 4  ;;  %v1537_v54 = vsel %vm231_vm0, %v1492_v23, -inf }
  0xe0   : > { %v1505_v57 = vrot.slane %v1504_v20, 2  ;;  %v1518_v30 = vmax.f32 %v1516_v43, %v1517_v17  ;;  %v1538_v2 = vrot.slane %v1537_v54, 4  ;;  %v1544_v58 = vsel %vm231_vm0, %v1491_v12, -inf }
  0xe1   : > { %v1512_v59 = vrot.slane %v1511_v35, 2  ;;  %v1525_v16 = vmax.f32 %v1523_v45, %v1524_v51  ;;  %v1532_v38 = vmax.f32 %v1530_v49, %v1531_v53  ;;  %v1545_v7 = vrot.slane %v1544_v58, 4 }
  0xe2   : > { %v1506_v19 = vmax.f32 %v1504_v20, %v1505_v57  ;;  %v1519_v9 = vrot.slane %v1518_v30, 2  ;;  %v1539_v62 = vmax.f32 %v1537_v54, %v1538_v2  ;;  %v1551_v63 = vsel %vm231_vm0, %v1493_v41, -inf  ;;  %v2191_v41 = vld [vmem:[%s2320_s13 + $0xc8] sm:$0xff] }
  0xe3   : > { %v1513_v1 = vmax.f32 %v1511_v35, %v1512_v59  ;;  %v1526_v24 = vrot.slane %v1525_v16, 2  ;;  %v1533_v46 = vrot.slane %v1532_v38, 2  ;;  %v1546_v44 = vmax.f32 %v1544_v58, %v1545_v7 }
  0xe4   : > { %v1507_v3 = vrot.slane %v1506_v19, 1  ;;  %v1520_v4 = vmax.f32 %v1518_v30, %v1519_v9  ;;  %v1540_v8 = vrot.slane %v1539_v62, 2  ;;  %v1552_v10 = vrot.slane %v1551_v63, 4 }
  0xe5   : > { %v1514_v14 = vrot.slane %v1513_v1, 1  ;;  %v1527_v22 = vmax.f32 %v1525_v16, %v1526_v24  ;;  %v1534_v26 = vmax.f32 %v1532_v38, %v1533_v46  ;;  %v1547_v50 = vrot.slane %v1546_v44, 2 }
  0xe6   : > { %v1508_v48 = vmax.f32 %v1506_v19, %v1507_v3  ;;  %v1521_v29 = vrot.slane %v1520_v4, 1  ;;  %v1541_v27 = vmax.f32 %v1539_v62, %v1540_v8  ;;  %v1553_v55 = vmax.f32 %v1551_v63, %v1552_v10 }
  0xe7   : > { %v1515_v31 = vmax.f32 %v1513_v1, %v1514_v14  ;;  %v1528_v52 = vrot.slane %v1527_v22, 1  ;;  %v1535_v32 = vrot.slane %v1534_v26, 1  ;;  %v1548_v33 = vmax.f32 %v1546_v44, %v1547_v50 }
  0xe8   : > { %v1522_v56 = vmax.f32 %v1520_v4, %v1521_v29  ;;  %v1542_v60 = vrot.slane %v1541_v27, 1  ;;  %v1554_v18 = vrot.slane %v1553_v55, 2  ;;  %v1558_v15 = vmax.f32 %v2681_v6, %v1508_v48 }
  0xe9   : > { %v1529_v36 = vmax.f32 %v1527_v22, %v1528_v52  ;;  %v1536_v0 = vmax.f32 %v1534_v26, %v1535_v32  ;;  %v1549_v12 = vrot.slane %v1548_v33, 1  ;;  %v1559_v25 = vmax.f32 %v2683_v21, %v1515_v31 }
  0xea   : > { %v1543_v39 = vmax.f32 %v1541_v27, %v1542_v60  ;;  %v1555_v40 = vmax.f32 %v1553_v55, %v1554_v18  ;;  %v1560_v23 = vmax.f32 %v2686_v28, %v1522_v56  ;;  %v1589_v42 = vcombine.high %v2190_v34, %v2190_v34 }
  0xeb   : > { %v1550_v43 = vmax.f32 %v1548_v33, %v1549_v12  ;;  %v1561_v20 = vmax.f32 %v2689_v13, %v1529_v36  ;;  %v1562_v17 = vmax.f32 %v2691_v11, %v1536_v0  ;;  %v1574_v45 = vsel %vm407_vm1, %v1559_v25, %v1558_v15 }
  0xec   : > { %v1556_v49 = vrot.slane %v1555_v40, 1  ;;  %v1563_v6 = vmax.f32 %v2694_v61, %v1543_v39  ;;  %v1575_v35 = vsel %vm409_vm2, %v1560_v23, %v1574_v45  ;;  %v1596_v21 = vrot.slane %v2190_v34, %v2322_v5  ;;  %v2192_v23 = vld [vmem:[%s2320_s13 + $0xd0] sm:$0xff] }
  0xed   : > { %v1564_v51 = vmax.f32 %v2699_v47, %v1550_v43  ;;  %v1576_v28 = vsel %vm411_vm3, %v1561_v20, %v1575_v35  ;;  %v1603_v53 = vrot.slane %v1589_v42, %v2322_v5  ;;  %v1606_v54 = vcombine.high %v2191_v41, %v2191_v41  ;;  %v2193_v35 = vld [vmem:[%s2320_s13 + $0xd8] sm:$0xff] }
  0xee   : > { %v1557_v57 = vmax.f32 %v1555_v40, %v1556_v49  ;;  %v1577_v13 = vsel %vm413_vm4, %v1562_v17, %v1576_v28  ;;  %v1604_v11 = vcombine.high %v1596_v21, %v1596_v21  ;;  %v1613_v30 = vrot.slane %v2191_v41, %v2322_v5 }
  0xef   : > { %v1578_v2 = vsel %vm415_vm5, %v1563_v6, %v1577_v13  ;;  %v1605_v61 = vcombine.high %v1603_v53, %v1603_v53  ;;  %v1620_v58 = vrot.slane %v1606_v54, %v2322_v5  ;;  %v1631_v59 = vsel %vm231_vm0, %v1596_v21, -inf }
  0xf0   : > { %v1565_v47 = vmax.f32 %v2701_v37, %v1557_v57  ;;  %v1579_v16 = vsel %vm417_vm6, %v1564_v51, %v1578_v2  ;;  %v1621_v38 = vcombine.high %v1613_v30, %v1613_v30  ;;  %v1632_v7 = vrot.slane %v1631_v59, 4 }
  0xf1   : > { %v1622_v19 = vcombine.high %v1620_v58, %v1620_v58  ;;  %v1638_v9 = vsel %vm231_vm0, %v1604_v11, -inf  ;;  %v1645_v62 = vsel %vm231_vm0, %v1603_v53, -inf  ;;  %v1652_v63 = vsel %vm231_vm0, %v1605_v61, -inf }
  0xf2   : > { %v1580_v1 = vsel %vm419_vm7, %v1565_v47, %v1579_v16  ;;  %v1633_v24 = vmax.f32 %v1631_v59, %v1632_v7  ;;  %v1639_v46 = vrot.slane %v1638_v9, 4  ;;  %v1646_v44 = vrot.slane %v1645_v62, 4 }
  0xf3   : > { %2189 = vst.msk [vmem:[%s2413_s17 + $0x28] sm:$0xff] %vm422_vm8, %v1580_v1  ;;  %v1653_v3 = vrot.slane %v1652_v63, 4  ;;  %v1659_v37 = vsel %vm231_vm0, %v1613_v30, -inf  ;;  %v1666_v4 = vsel %vm231_vm0, %v1621_v38, -inf  ;;  %v1673_v8 = vsel %vm231_vm0, %v1620_v58, -inf }
  0xf4   : > { %v1634_v10 = vrot.slane %v1633_v24, 2  ;;  %v1640_v14 = vmax.f32 %v1638_v9, %v1639_v46  ;;  %v1647_v22 = vmax.f32 %v1645_v62, %v1646_v44  ;;  %v1660_v26 = vrot.slane %v1659_v37, 4 }
  0xf5   : > { %v1654_v50 = vmax.f32 %v1652_v63, %v1653_v3  ;;  %v1667_v48 = vrot.slane %v1666_v4, 4  ;;  %v1674_v29 = vrot.slane %v1673_v8, 4  ;;  %v1680_v27 = vsel %vm231_vm0, %v1622_v19, -inf }
  0xf6   : > { %v1635_v55 = vmax.f32 %v1633_v24, %v1634_v10  ;;  %v1641_v31 = vrot.slane %v1640_v14, 2  ;;  %v1648_v52 = vrot.slane %v1647_v22, 2  ;;  %v1661_v32 = vmax.f32 %v1659_v37, %v1660_v26 }
  0xf7   : > { %v1655_v33 = vrot.slane %v1654_v50, 2  ;;  %v1668_v34 = vmax.f32 %v1666_v4, %v1667_v48  ;;  %v1675_v56 = vmax.f32 %v1673_v8, %v1674_v29  ;;  %v1681_v60 = vrot.slane %v1680_v27, 4 }
  0xf8   : > { %v1636_v18 = vrot.slane %v1635_v55, 1  ;;  %v1642_v15 = vmax.f32 %v1640_v14, %v1641_v31  ;;  %v1649_v36 = vmax.f32 %v1647_v22, %v1648_v52  ;;  %v1662_v0 = vrot.slane %v1661_v32, 2 }
  0xf9   : > { %v1656_v12 = vmax.f32 %v1654_v50, %v1655_v33  ;;  %v1669_v25 = vrot.slane %v1668_v34, 2  ;;  %v1676_v39 = vrot.slane %v1675_v56, 2  ;;  %v1682_v40 = vmax.f32 %v1680_v27, %v1681_v60 }
  0xfa   : > { %v2742_v41 = vmax.f32 %v1635_v55, %v1636_v18  ;;  %v1643_v42 = vrot.slane %v1642_v15, 1  ;;  %v1650_v43 = vrot.slane %v1649_v36, 1  ;;  %v1663_v20 = vmax.f32 %v1661_v32, %v1662_v0 }
  0xfb   : > { %v1657_v17 = vrot.slane %v1656_v12, 1  ;;  %v1670_v45 = vmax.f32 %v1668_v34, %v1669_v25  ;;  %v1677_v49 = vmax.f32 %v1675_v56, %v1676_v39  ;;  %v1683_v6 = vrot.slane %v1682_v40, 2 }
  0xfc   : > { %v2745_v21 = vmax.f32 %v1642_v15, %v1643_v42  ;;  %v2747_v51 = vmax.f32 %v1649_v36, %v1650_v43  ;;  %v1664_v28 = vrot.slane %v1663_v20, 1  ;;  %v1692_v53 = vcombine.high %v2192_v23, %v2192_v23 }
  0xfd   : > { %v2749_v54 = vmax.f32 %v1656_v12, %v1657_v17  ;;  %v1671_v57 = vrot.slane %v1670_v45, 1  ;;  %v1678_v13 = vrot.slane %v1677_v49, 1  ;;  %v1684_v11 = vmax.f32 %v1682_v40, %v1683_v6 }
  0xfe   : > { %v2751_v30 = vmax.f32 %v1663_v20, %v1664_v28  ;;  %v1699_v2 = vrot.slane %v2192_v23, %v2322_v5  ;;  %v1706_v61 = vrot.slane %v1692_v53, %v2322_v5  ;;  %v1709_v58 = vcombine.high %v2193_v35, %v2193_v35 }
  0xff   : > { %v2755_v59 = vmax.f32 %v1670_v45, %v1671_v57  ;;  %v2757_v47 = vmax.f32 %v1677_v49, %v1678_v13  ;;  %v1685_v16 = vrot.slane %v1684_v11, 1  ;;  %v1716_v38 = vrot.slane %v2193_v35, %v2322_v5 }
 0x100   : > { %v1707_v7 = vcombine.high %v1699_v2, %v1699_v2  ;;  %v1708_v19 = vcombine.high %v1706_v61, %v1706_v61  ;;  %v1723_v9 = vrot.slane %v1709_v58, %v2322_v5  ;;  %v1734_v62 = vsel %vm231_vm0, %v1699_v2, -inf }
 0x101   : > { %v2762_v63 = vmax.f32 %v1684_v11, %v1685_v16  ;;  %v1724_v1 = vcombine.high %v1716_v38, %v1716_v38  ;;  %v1735_v24 = vrot.slane %v1734_v62, 4  ;;  %v1748_v46 = vsel %vm231_vm0, %v1706_v61, -inf  ;;  %v2195_v61 = vld [vmem:[%s2320_s13 + $0xe0] sm:$0xff] }
 0x102   : > { %v1725_v44 = vcombine.high %v1723_v9, %v1723_v9  ;;  %v1741_v3 = vsel %vm231_vm0, %v1707_v7, -inf  ;;  %v1749_v37 = vrot.slane %v1748_v46, 4  ;;  %v1755_v4 = vsel %vm231_vm0, %v1708_v19, -inf }
 0x103   : > { %v1736_v8 = vmax.f32 %v1734_v62, %v1735_v24  ;;  %v1742_v10 = vrot.slane %v1741_v3, 4  ;;  %v1756_v14 = vrot.slane %v1755_v4, 4  ;;  %v1762_v22 = vsel %vm231_vm0, %v1716_v38, -inf  ;;  %v2196_v24 = vld [vmem:[%s2320_s13 + $0xe8] sm:$0xff] }
 0x104   : > { %v1750_v26 = vmax.f32 %v1748_v46, %v1749_v37  ;;  %v1763_v50 = vrot.slane %v1762_v22, 4  ;;  %v1769_v48 = vsel %vm231_vm0, %v1724_v1, -inf  ;;  %v1776_v29 = vsel %vm231_vm0, %v1723_v9, -inf }
 0x105   : > { %v1737_v27 = vrot.slane %v1736_v8, 2  ;;  %v1743_v55 = vmax.f32 %v1741_v3, %v1742_v10  ;;  %v1757_v31 = vmax.f32 %v1755_v4, %v1756_v14  ;;  %v1770_v52 = vrot.slane %v1769_v48, 4 }
 0x106   : > { %v1751_v32 = vrot.slane %v1750_v26, 2  ;;  %v1764_v33 = vmax.f32 %v1762_v22, %v1763_v50  ;;  %v1777_v34 = vrot.slane %v1776_v29, 4  ;;  %v1783_v56 = vsel %vm231_vm0, %v1725_v44, -inf }
 0x107   : > { %v1738_v60 = vmax.f32 %v1736_v8, %v1737_v27  ;;  %v1744_v18 = vrot.slane %v1743_v55, 2  ;;  %v1758_v15 = vrot.slane %v1757_v31, 2  ;;  %v1771_v36 = vmax.f32 %v1769_v48, %v1770_v52 }
 0x108   : > { %v1752_v0 = vmax.f32 %v1750_v26, %v1751_v32  ;;  %v1765_v12 = vrot.slane %v1764_v33, 2  ;;  %v1778_v25 = vmax.f32 %v1776_v29, %v1777_v34  ;;  %v1784_v39 = vrot.slane %v1783_v56, 4 }
 0x109   : > { %v1739_v40 = vrot.slane %v1738_v60, 1  ;;  %v1745_v23 = vmax.f32 %v1743_v55, %v1744_v18  ;;  %v1759_v42 = vmax.f32 %v1757_v31, %v1758_v15  ;;  %v1772_v43 = vrot.slane %v1771_v36, 2 }
 0x10a   : > { %v1753_v20 = vrot.slane %v1752_v0, 1  ;;  %v1766_v17 = vmax.f32 %v1764_v33, %v1765_v12  ;;  %v1779_v45 = vrot.slane %v1778_v25, 2  ;;  %v1785_v49 = vmax.f32 %v1783_v56, %v1784_v39 }
 0x10b   : > { %v1740_v6 = vmax.f32 %v1738_v60, %v1739_v40  ;;  %v1746_v35 = vrot.slane %v1745_v23, 1  ;;  %v1760_v28 = vrot.slane %v1759_v42, 1  ;;  %v1773_v53 = vmax.f32 %v1771_v36, %v1772_v43 }
 0x10c   : > { %v1754_v57 = vmax.f32 %v1752_v0, %v1753_v20  ;;  %v1767_v13 = vrot.slane %v1766_v17, 1  ;;  %v1780_v11 = vmax.f32 %v1778_v25, %v1779_v45  ;;  %v1786_v2 = vrot.slane %v1785_v49, 2 }
 0x10d   : > { %v1747_v58 = vmax.f32 %v1745_v23, %v1746_v35  ;;  %v1761_v16 = vmax.f32 %v1759_v42, %v1760_v28  ;;  %v1774_v38 = vrot.slane %v1773_v53, 1  ;;  %v1790_v7 = vmax.f32 %v2742_v41, %v1740_v6 }
 0x10e   : > { %v1768_v19 = vmax.f32 %v1766_v17, %v1767_v13  ;;  %v1781_v9 = vrot.slane %v1780_v11, 1  ;;  %v1787_v62 = vmax.f32 %v1785_v49, %v1786_v2  ;;  %v1792_v1 = vmax.f32 %v2747_v51, %v1754_v57 }
 0x10f   : > { %v1775_v46 = vmax.f32 %v1773_v53, %v1774_v38  ;;  %v1791_v44 = vmax.f32 %v2745_v21, %v1747_v58  ;;  %v1793_v3 = vmax.f32 %v2749_v54, %v1761_v16  ;;  %v1821_v37 = vcombine.high %v2195_v61, %v2195_v61 }
 0x110   : > { %v1782_v4 = vmax.f32 %v1780_v11, %v1781_v9  ;;  %v1788_v8 = vrot.slane %v1787_v62, 1  ;;  %v1794_v10 = vmax.f32 %v2751_v30, %v1768_v19  ;;  %v1828_v14 = vrot.slane %v2195_v61, %v2322_v5 }
 0x111   : > { %v1795_v41 = vmax.f32 %v2755_v59, %v1775_v46  ;;  %v1806_v22 = vsel %vm407_vm1, %v1791_v44, %v1790_v7  ;;  %v1835_v26 = vrot.slane %v1821_v37, %v2322_v5  ;;  %v1838_v51 = vcombine.high %v2196_v24, %v2196_v24  ;;  %v2197_v44 = vld [vmem:[%s2320_s13 + $0xf0] sm:$0xff] }
 0x112   : > { %v1789_v50 = vmax.f32 %v1787_v62, %v1788_v8  ;;  %v1796_v48 = vmax.f32 %v2757_v47, %v1782_v4  ;;  %v1807_v21 = vsel %vm409_vm2, %v1792_v1, %v1806_v22  ;;  %v1836_v54 = vcombine.high %v1828_v14, %v1828_v14  ;;  %v2198_v22 = vld [vmem:[%s2320_s13 + $0xf8] sm:$0xff] }
 0x113   : > { %v1808_v29 = vsel %vm411_vm3, %v1793_v3, %v1807_v21  ;;  %v1837_v27 = vcombine.high %v1835_v26, %v1835_v26  ;;  %v1845_v30 = vrot.slane %v2196_v24, %v2322_v5  ;;  %v1852_v55 = vrot.slane %v1838_v51, %v2322_v5 }
 0x114   : > { %v1797_v59 = vmax.f32 %v2762_v63, %v1789_v50  ;;  %v1809_v31 = vsel %vm413_vm4, %v1794_v10, %v1808_v29  ;;  %v1863_v52 = vsel %vm231_vm0, %v1828_v14, -inf  ;;  %v1870_v32 = vsel %vm231_vm0, %v1836_v54, -inf }
 0x115   : > { %v1810_v47 = vsel %vm415_vm5, %v1795_v41, %v1809_v31  ;;  %v1853_v33 = vcombine.high %v1845_v30, %v1845_v30  ;;  %v1854_v34 = vcombine.high %v1852_v55, %v1852_v55  ;;  %v1864_v56 = vrot.slane %v1863_v52, 4 }
 0x116   : > { %v1811_v60 = vsel %vm417_vm6, %v1796_v48, %v1810_v47  ;;  %v1871_v18 = vrot.slane %v1870_v32, 4  ;;  %v1877_v15 = vsel %vm231_vm0, %v1835_v26, -inf  ;;  %v1884_v36 = vsel %vm231_vm0, %v1837_v27, -inf }
 0x117   : > { %v1812_v63 = vsel %vm419_vm7, %v1797_v59, %v1811_v60  ;;  %v1865_v0 = vmax.f32 %v1863_v52, %v1864_v56  ;;  %v1878_v12 = vrot.slane %v1877_v15, 4  ;;  %v1885_v25 = vrot.slane %v1884_v36, 4 }
 0x118   : > { %2194 = vst.msk [vmem:[%s2413_s17 + $0x30] sm:$0xff] %vm422_vm8, %v1812_v63  ;;  %v1872_v39 = vmax.f32 %v1870_v32, %v1871_v18  ;;  %v1891_v40 = vsel %vm231_vm0, %v1845_v30, -inf  ;;  %v1898_v23 = vsel %vm231_vm0, %v1853_v33, -inf  ;;  %v1905_v42 = vsel %vm231_vm0, %v1852_v55, -inf }
 0x119   : > { %v1866_v43 = vrot.slane %v1865_v0, 2  ;;  %v1879_v20 = vmax.f32 %v1877_v15, %v1878_v12  ;;  %v1886_v17 = vmax.f32 %v1884_v36, %v1885_v25  ;;  %v1892_v45 = vrot.slane %v1891_v40, 4 }
 0x11a   : > { %v1873_v49 = vrot.slane %v1872_v39, 2  ;;  %v1899_v6 = vrot.slane %v1898_v23, 4  ;;  %v1906_v35 = vrot.slane %v1905_v42, 4  ;;  %v1912_v28 = vsel %vm231_vm0, %v1854_v34, -inf }
 0x11b   : > { %v1867_v53 = vmax.f32 %v1865_v0, %v1866_v43  ;;  %v1880_v57 = vrot.slane %v1879_v20, 2  ;;  %v1887_v13 = vrot.slane %v1886_v17, 2  ;;  %v1893_v11 = vmax.f32 %v1891_v40, %v1892_v45 }
 0x11c   : > { %v1874_v2 = vmax.f32 %v1872_v39, %v1873_v49  ;;  %v1900_v61 = vmax.f32 %v1898_v23, %v1899_v6  ;;  %v1907_v58 = vmax.f32 %v1905_v42, %v1906_v35  ;;  %v1913_v16 = vrot.slane %v1912_v28, 4 }
 0x11d   : > { %v1868_v38 = vrot.slane %v1867_v53, 1  ;;  %v1881_v7 = vmax.f32 %v1879_v20, %v1880_v57  ;;  %v1888_v19 = vmax.f32 %v1886_v17, %v1887_v13  ;;  %v1894_v9 = vrot.slane %v1893_v11, 2 }
 0x11e   : > { %v1875_v62 = vrot.slane %v1874_v2, 1  ;;  %v1901_v1 = vrot.slane %v1900_v61, 2  ;;  %v1908_v24 = vrot.slane %v1907_v58, 2  ;;  %v1914_v46 = vmax.f32 %v1912_v28, %v1913_v16 }
 0x11f   : > { %v1882_v3 = vrot.slane %v1881_v7, 1  ;;  %v1889_v37 = vrot.slane %v1888_v19, 1  ;;  %v1895_v4 = vmax.f32 %v1893_v11, %v1894_v9  ;;  %v2803_v8 = vmax.f32 %v1867_v53, %v1868_v38 }
 0x120   : > { %v1902_v10 = vmax.f32 %v1900_v61, %v1901_v1  ;;  %v1909_v14 = vmax.f32 %v1907_v58, %v1908_v24  ;;  %v1915_v41 = vrot.slane %v1914_v46, 2  ;;  %v2806_v26 = vmax.f32 %v1874_v2, %v1875_v62 }
 0x121   : > { %v2808_v51 = vmax.f32 %v1881_v7, %v1882_v3  ;;  %v1896_v50 = vrot.slane %v1895_v4, 1  ;;  %v1924_v48 = vcombine.high %v2197_v44, %v2197_v44  ;;  %v1931_v27 = vrot.slane %v2197_v44, %v2322_v5 }
 0x122   : > { %v1903_v21 = vrot.slane %v1902_v10, 1  ;;  %v1910_v54 = vrot.slane %v1909_v14, 1  ;;  %v2810_v29 = vmax.f32 %v1914_v46, %v1915_v41  ;;  %v2813_v30 = vmax.f32 %v1888_v19, %v1889_v37 }
 0x123   : > { %v1938_v55 = vrot.slane %v1924_v48, %v2322_v5  ;;  %v1941_v59 = vcombine.high %v2198_v22, %v2198_v22  ;;  %v1948_v31 = vrot.slane %v2198_v22, %v2322_v5  ;;  %v2817_v52 = vmax.f32 %v1895_v4, %v1896_v50 }
 0x124   : > { %v2819_v32 = vmax.f32 %v1902_v10, %v1903_v21  ;;  %v2821_v47 = vmax.f32 %v1909_v14, %v1910_v54  ;;  %v1939_v33 = vcombine.high %v1931_v27, %v1931_v27  ;;  %v1966_v18 = vsel %vm231_vm0, %v1931_v27, -inf }
 0x125   : > { %v1940_v34 = vcombine.high %v1938_v55, %v1938_v55  ;;  %v1955_v56 = vrot.slane %v1941_v59, %v2322_v5  ;;  %v1956_v60 = vcombine.high %v1948_v31, %v1948_v31  ;;  %v1917_v15 = vrot.slane %v2810_v29, 1 }
 0x126   : > { %v1967_v36 = vrot.slane %v1966_v18, 4  ;;  %v1973_v63 = vsel %vm231_vm0, %v1939_v33, -inf  ;;  %v1980_v0 = vsel %vm231_vm0, %v1938_v55, -inf  ;;  %v1994_v43 = vsel %vm231_vm0, %v1948_v31, -inf }
 0x127   : > { %v1957_v12 = vcombine.high %v1955_v56, %v1955_v56  ;;  %v1974_v25 = vrot.slane %v1973_v63, 4  ;;  %v1981_v39 = vrot.slane %v1980_v0, 4  ;;  %v1987_v40 = vsel %vm231_vm0, %v1940_v34, -inf }
 0x128   : > { %v1968_v23 = vmax.f32 %v1966_v18, %v1967_v36  ;;  %v1988_v42 = vrot.slane %v1987_v40, 4  ;;  %v2001_v5 = vsel %vm231_vm0, %v1956_v60, -inf  ;;  %v1995_v45 = vrot.slane %v1994_v43, 4 }
 0x129   : > { %v1975_v20 = vmax.f32 %v1973_v63, %v1974_v25  ;;  %v1982_v17 = vmax.f32 %v1980_v0, %v1981_v39  ;;  %v2002_v49 = vrot.slane %v2001_v5, 4  ;;  %v2008_v28 = vsel %vm231_vm0, %v1955_v56, -inf }
 0x12a   : > { %v1969_v6 = vrot.slane %v1968_v23, 2  ;;  %v1989_v35 = vmax.f32 %v1987_v40, %v1988_v42  ;;  %v2015_v53 = vsel %vm231_vm0, %v1957_v12, -inf  ;;  %v1996_v11 = vmax.f32 %v1994_v43, %v1995_v45 }
 0x12b   : > { %v1976_v57 = vrot.slane %v1975_v20, 2  ;;  %v1983_v13 = vrot.slane %v1982_v17, 2  ;;  %v2003_v2 = vmax.f32 %v2001_v5, %v2002_v49  ;;  %v2009_v16 = vrot.slane %v2008_v28, 4 }
 0x12c   : > { %v1970_v61 = vmax.f32 %v1968_v23, %v1969_v6  ;;  %v1990_v58 = vrot.slane %v1989_v35, 2  ;;  %v2016_v38 = vrot.slane %v2015_v53, 4  ;;  %v1997_v9 = vrot.slane %v1996_v11, 2 }
 0x12d   : > { %v1977_v7 = vmax.f32 %v1975_v20, %v1976_v57  ;;  %v1984_v19 = vmax.f32 %v1982_v17, %v1983_v13  ;;  %v2004_v62 = vrot.slane %v2003_v2, 2  ;;  %v2010_v46 = vmax.f32 %v2008_v28, %v2009_v16 }
 0x12e   : > { %v1971_v1 = vrot.slane %v1970_v61, 1  ;;  %v1991_v24 = vmax.f32 %v1989_v35, %v1990_v58  ;;  %v2017_v44 = vmax.f32 %v2015_v53, %v2016_v38  ;;  %v1998_v4 = vmax.f32 %v1996_v11, %v1997_v9 }
 0x12f   : > { %v1978_v3 = vrot.slane %v1977_v7, 1  ;;  %v1985_v37 = vrot.slane %v1984_v19, 1  ;;  %v2005_v10 = vmax.f32 %v2003_v2, %v2004_v62  ;;  %v2011_v22 = vrot.slane %v2010_v46, 2 }
 0x130   : > { %v1972_v14 = vmax.f32 %v1970_v61, %v1971_v1  ;;  %v1992_v41 = vrot.slane %v1991_v24, 1  ;;  %v2018_v50 = vrot.slane %v2017_v44, 2  ;;  %v1999_v54 = vrot.slane %v1998_v4, 1 }
 0x131   : > { %v1979_v48 = vmax.f32 %v1977_v7, %v1978_v3  ;;  %v1986_v21 = vmax.f32 %v1984_v19, %v1985_v37  ;;  %v2006_v27 = vrot.slane %v2005_v10, 1  ;;  %v2012_v59 = vmax.f32 %v2010_v46, %v2011_v22 }
 0x132   : > { %v1993_v55 = vmax.f32 %v1991_v24, %v1992_v41  ;;  %v2019_v31 = vmax.f32 %v2017_v44, %v2018_v50  ;;  %v2022_v33 = vmax.f32 %v2803_v8, %v1972_v14  ;;  %v2000_v34 = vmax.f32 %v1998_v4, %v1999_v54 }
 0x133   : > { %v2007_v56 = vmax.f32 %v2005_v10, %v2006_v27  ;;  %v2023_v60 = vmax.f32 %v2806_v26, %v1979_v48  ;;  %v2024_v18 = vmax.f32 %v2808_v51, %v1986_v21  ;;  %v1918_v36 = vmax.f32 %v2810_v29, %v1917_v15 }
 0x134   : > { %v2013_v63 = vrot.slane %v2012_v59, 1  ;;  %v2020_v0 = vrot.slane %v2019_v31, 1  ;;  %v2025_v12 = vmax.f32 %v2813_v30, %v1993_v55  ;;  %v2026_v25 = vmax.f32 %v2817_v52, %v2000_v34 }
 0x135   : > { %v2027_v39 = vmax.f32 %v2819_v32, %v2007_v56  ;;  %v2038_v40 = vsel %vm407_vm1, %v2023_v60, %v2022_v33 }
 0x136   : > { %v2014_v8 = vmax.f32 %v2012_v59, %v2013_v63  ;;  %v2021_v23 = vmax.f32 %v2019_v31, %v2020_v0  ;;  %v2039_v42 = vsel %vm409_vm2, %v2024_v18, %v2038_v40 }
 0x137   : > { %v2040_v26 = vsel %vm411_vm3, %v2025_v12, %v2039_v42 }
 0x138   : > { %v2028_v51 = vmax.f32 %v2821_v47, %v2014_v8  ;;  %v2029_v29 = vmax.f32 %v1918_v36, %v2021_v23  ;;  %v2041_v15 = vsel %vm413_vm4, %v2026_v25, %v2040_v26 }
 0x139   : > { %v2042_v43 = vsel %vm415_vm5, %v2027_v39, %v2041_v15 }
 0x13a   : > { %v2043_v30 = vsel %vm417_vm6, %v2028_v51, %v2042_v43 }
 0x13b   : > { %v2044_v52 = vsel %vm419_vm7, %v2029_v29, %v2043_v30 }
 0x13c   : > { %2199 = vst.msk [vmem:[%s2413_s17 + $0x38] sm:$0xff] %vm422_vm8, %v2044_v52 }
 0x13d PF: > { %s11_s8 = sadd.s32 1, %s2283_s8   ;;  %s2861_s6 = smov %s2279_s7 }
 0x13e   : > { %p8_p5 = scmp.ge.s32.totalorder %s11_s8, 4   ;;  %s2862_s7 = smov %s2864_s9 }
 0x140   :  { %10 = sbr.rel (!%p8_p5) target bundleno = 2 (0x2), region = 76 }

</bundles_post_ra>
